<compile_context>
chip_gen: v6e
topology: v6e:2x2x1
jax: 0.10.0
libtpu: 0.0.40
codegen_flags: <defaults>
</compile_context>

<pallas_src>
import numpy as np

import jax
import jax.numpy as jnp
from jax.experimental import pallas as pl
from jax.experimental.pallas import tpu as pltpu  # noqa: F401  (TPU backend)

# ----------------------------- configuration --------------------------------
B = 2          # batch
N = 8          # sequence length
D_MODEL = 32   # d_model
N_HEADS = 4
D_HEAD = D_MODEL // N_HEADS
N_LAYERS = 4
BN = B * N

SCALE_INIT = 1.0
SCALE_SCALE = D_MODEL ** (-0.5)
ALPHA_INIT = 1.0 / N_LAYERS
ALPHA_SCALE = D_MODEL ** (-0.5)
ATTN_SCALE = float(D_HEAD) ** 0.5   # reference MultiHeadAttention *multiplies* by sqrt(d_head)
NEG_INF = -1e30


# ----------------------------- fused Pallas kernel ---------------------------
def _dit_block_kernel(x_ref, t_ref,
                      mod_w_ref, mod_b_ref, bc_ref,
                      qw_ref, kw_ref, vw_ref, scale_ref,
                      cos_ref, sin_ref, rot_ref, hsum_ref,
                      hmask_ref, eye_ref, bmask_ref,
                      ow_ref, ob_ref, alpha_attn_ref,
                      w1_ref, b1_ref, w2_ref, b2_ref, alpha_mlp_ref,
                      o_ref):
    """Single invocation: full batch (B*N, D) stays in VMEM/vregs end to end."""
    f32 = jnp.float32
    x = x_ref[...].astype(f32)           # (BN, D)
    t = t_ref[...].astype(f32)           # (B, D)

    bc = bc_ref[...]                     # (BN, B)  per-batch broadcast matrix
    hsum = hsum_ref[...]                 # (D, D)   block-diag ones (per-head ssq)
    eye = eye_ref[...]                   # (BN, BN) identity (hoisted constant)
    bmask = bmask_ref[...]               # (BN, BN) additive cross-batch mask (0 / -1e30)

    def norm_full(y):
        # TODO(synk): Norm() definition not provided; assume F.normalize (L2, last dim).
        ssq = jnp.sum(y * y, axis=-1, keepdims=True)
        return y * jax.lax.rsqrt(jnp.maximum(ssq, 1e-24))

    def norm_heads(y):
        # Per-head L2 norm over each head's D_HEAD channels, via a matmul with a
        # block-diagonal ones matrix (no reshapes / lane shuffles).
        ssq = jnp.dot(y * y, hsum, preferred_element_type=f32)
        return y * jax.lax.rsqrt(jnp.maximum(ssq, 1e-24))

    # --- DoubleModBlock: SiLU(t_emb) -> Linear(D, 6D) -> 2x(shift, scale, gate)
    # TODO(synk): DoubleModBlock definition not provided; adaLN-style modulation assumed.
    t_act = t * (1.0 / (1.0 + jnp.exp(-t)))                            # SiLU, (B, D)
    t_full = jnp.dot(bc, t_act, preferred_element_type=f32)            # (BN, D) per-batch rows
    mods = []
    for i in range(6):                                                 # pre-split (6, D, D)
        mods.append(jnp.dot(t_full, mod_w_ref[i], preferred_element_type=f32)
                    + mod_b_ref[i])
    sh1, sc1, g1, sh2, sc2, g2 = mods                                  # each (BN, D)

    # --- Attention branch -----------------------------------------------------
    resid1 = x
    xm = x * (1.0 + sc1) + sh1                                         # mod1.first_step
    q = jnp.dot(xm, qw_ref[...], preferred_element_type=f32)           # (BN, D)
    k = jnp.dot(xm, kw_ref[...], preferred_element_type=f32)
    v = jnp.dot(xm, vw_ref[...], preferred_element_type=f32)

    scale = scale_ref[...]                                             # (1, D), prefolded
    q = norm_heads(q) * scale
    k = norm_heads(k) * scale

    # RoPE (rotate-half per head) via a precomputed signed permutation matrix.
    # TODO(synk): RoPEEmbedding definition not provided; standard theta=10000
    # rotate-half RoPE along the sequence axis assumed.
    cos = cos_ref[...]
    sin = sin_ref[...]
    rot = rot_ref[...]
    q = q * cos + jnp.dot(q, rot, preferred_element_type=f32) * sin
    k = k * cos + jnp.dot(k, rot, preferred_element_type=f32) * sin

    # Per-head attention with lane masks (no slicing / concatenation), reproducing
    # the reference exactly, including the einsum 'bhnm,bhmd->bhmd' (column-sum of
    # the softmax over n, times v) and the *multiplication* by sqrt(d_head).
    # Cross-batch interactions are killed by the additive -1e30 block mask.
    attn = jnp.zeros_like(x)
    for h in range(N_HEADS):
        hm = hmask_ref[h]                                              # (1, D) head lane mask
        qh = q * hm
        kh = k * hm
        vh = v * hm
        s = jax.lax.dot_general(qh, kh, (((1,), (1,)), ((), ())),
                                preferred_element_type=f32) * ATTN_SCALE   # (BN, BN)
        s = s + bmask
        s = s - jnp.max(s, axis=-1, keepdims=True)
        p = jnp.exp(s)
        p = p * pl.reciprocal(jnp.sum(p, axis=-1, keepdims=True), approx=True)
        col = jnp.sum(p, axis=0, keepdims=True)                        # (1, BN) sum over n
        # out_h[m, :] = col[m] * v_h[m, :]  == diag(col) @ v_h  (no transposes);
        # masked v lanes make the add act like a head concat.
        attn = attn + jnp.dot(eye * col, vh, preferred_element_type=f32)

    attn = jnp.dot(attn, ow_ref[...], preferred_element_type=f32) + ob_ref[...]
    attn = g1 * norm_full(attn)                                        # mod1.second_step(norm(.))
    x1 = norm_full(resid1 + alpha_attn_ref[...] * (attn - resid1))

    # --- MLP branch -------------------------------------------------------------
    # TODO(synk): MLP definition not provided; Linear(D,4D)->GELU->Linear(4D,D) assumed.
    resid2 = x1
    xm2 = x1 * (1.0 + sc2) + sh2                                       # mod2.first_step
    hdn = jnp.dot(xm2, w1_ref[...], preferred_element_type=f32) + b1_ref[...]
    hdn = jax.nn.gelu(hdn, approximate=True)
    mlp = jnp.dot(hdn, w2_ref[...], preferred_element_type=f32) + b2_ref[...]
    mlp = g2 * mlp                                                     # mod2.second_step
    out = norm_full(resid2 + alpha_mlp_ref[...] * (mlp - resid2))

    o_ref[...] = out.astype(o_ref.dtype)


# ----------------------------- wrapper ---------------------------------------
@jax.jit
def dit_block_forward(x, t_emb, weights):
    Bb, Nn, Dd = x.shape
    x2 = x.reshape(Bb * Nn, Dd)         # lane-dense (B*N, D) slab; all work in one step
    out2 = pl.pallas_call(
        _dit_block_kernel,
        out_shape=jax.ShapeDtypeStruct((Bb * Nn, Dd), x.dtype),
    )(x2, t_emb, *weights)
    return out2.reshape(Bb, Nn, Dd)


# ------------------------ constant-table construction ------------------------
def _rope_tables():
    pos = np.arange(N, dtype=np.float32)
    inv = 1.0 / (10000.0 ** (np.arange(0, D_HEAD, 2, dtype=np.float32) / D_HEAD))
    ang = pos[:, None] * inv[None, :]                                  # (N, DH//2)
    cos = np.concatenate([np.cos(ang), np.cos(ang)], axis=-1)          # (N, DH)
    sin = np.concatenate([np.sin(ang), np.sin(ang)], axis=-1)
    cos = np.tile(np.tile(cos, (1, N_HEADS)), (B, 1))                  # (B*N, D)
    sin = np.tile(np.tile(sin, (1, N_HEADS)), (B, 1))
    return cos, sin


def _rope_rot_matrix():
    """x @ R == per-head rotate_half(x) = concat(-x2, x1) within each head."""
    R = np.zeros((D_MODEL, D_MODEL), np.float32)
    half = D_HEAD // 2
    for h in range(N_HEADS):
        o = h * D_HEAD
        for j in range(half):
            R[o + j + half, o + j] = -1.0
            R[o + j, o + j + half] = 1.0
    return R


def _head_sum_matrix():
    """(x*x) @ M -> per-channel sum of squares over that channel's head."""
    return np.kron(np.eye(N_HEADS, dtype=np.float32),
                   np.ones((D_HEAD, D_HEAD), np.float32))


def _head_lane_masks():
    """(H, 1, D) 0/1 masks selecting each head's lanes."""
    m = np.kron(np.eye(N_HEADS, dtype=np.float32),
                np.ones((1, D_HEAD), np.float32))                      # (H, D)
    return m.reshape(N_HEADS, 1, D_MODEL)


def _batch_broadcast():
    """(B*N, B) matrix: row b*N+n selects batch b."""
    return np.kron(np.eye(B, dtype=np.float32), np.ones((N, 1), np.float32))


def _batch_mask():
    """(B*N, B*N) additive mask: 0 within the same batch, -1e30 across batches."""
    same = np.kron(np.eye(B, dtype=np.float32), np.ones((N, N), np.float32))
    return (1.0 - same) * NEG_INF


def prepare_params(p):
    """Fold constant rescalings, split fused weights, build constant tables."""
    f32 = jnp.float32
    cos, sin = _rope_tables()
    D = D_MODEL

    mod_w = jnp.stack([p["mod_w"][:, i * D:(i + 1) * D] for i in range(6)])   # (6, D, D)
    mod_b = p["mod_b"].reshape(6, 1, D)

    return (
        mod_w.astype(f32), mod_b.astype(f32),
        jnp.asarray(_batch_broadcast(), f32),
        p["qkv_w"][:, :D], p["qkv_w"][:, D:2 * D], p["qkv_w"][:, 2 * D:],     # q/k/v (D, D)
        (p["attn_scale"] * (SCALE_INIT / SCALE_SCALE)).reshape(1, D).astype(f32),
        jnp.asarray(cos, f32), jnp.asarray(sin, f32),
        jnp.asarray(_rope_rot_matrix(), f32), jnp.asarray(_head_sum_matrix(), f32),
        jnp.asarray(_head_lane_masks(), f32),
        jnp.asarray(np.eye(BN, dtype=np.float32), f32),
        jnp.asarray(_batch_mask(), f32),
        p["out_w"], p["out_b"].reshape(1, -1),
        (p["alpha_attn"] * (ALPHA_INIT / ALPHA_SCALE)).reshape(1, D).astype(f32),
        p["mlp_w1"], p["mlp_b1"].reshape(1, -1),
        p["mlp_w2"], p["mlp_b2"].reshape(1, -1),
        (p["alpha_mlp"] * (ALPHA_INIT / ALPHA_SCALE)).reshape(1, D).astype(f32),
    )


# ----------------------------- parameter init --------------------------------
def init_params(key):
    ks = jax.random.split(key, 8)
    f32 = jnp.float32

    def w(k, shape, scale=0.02):
        return (scale * jax.random.normal(k, shape)).astype(f32)

    return {
        # DoubleModBlock linear (stored transposed: (in, out))
        "mod_w": w(ks[0], (D_MODEL, 6 * D_MODEL)),
        "mod_b": jnp.zeros((6 * D_MODEL,), f32),
        # Attn
        "qkv_w": w(ks[1], (D_MODEL, 3 * D_MODEL)),
        "out_w": w(ks[2], (D_MODEL, D_MODEL)),
        "out_b": jnp.zeros((D_MODEL,), f32),
        "attn_scale": jnp.full((N_HEADS, D_HEAD), SCALE_SCALE, f32),
        # MLP
        "mlp_w1": w(ks[3], (D_MODEL, 4 * D_MODEL)),
        "mlp_b1": jnp.zeros((4 * D_MODEL,), f32),
        "mlp_w2": w(ks[4], (4 * D_MODEL, D_MODEL)),
        "mlp_b2": jnp.zeros((D_MODEL,), f32),
        # DiTBlock alphas
        "alpha_attn": jnp.full((D_MODEL,), ALPHA_SCALE, f32),
        "alpha_mlp": jnp.full((D_MODEL,), ALPHA_SCALE, f32),
    }


# --------------------------------- main ---------------------------------------
if __name__ == "__main__":
    key = jax.random.PRNGKey(0)
    kp, kx, kt = jax.random.split(key, 3)
    params = init_params(kp)
    weights = prepare_params(params)

    x = jax.random.normal(kx, (B, N, D_MODEL), dtype=jnp.float32)
    t_emb = jax.random.normal(kt, (B, D_MODEL), dtype=jnp.float32)

    out = dit_block_forward(x, t_emb, weights)
    out = jax.block_until_ready(out)
    assert out.shape == (B, N, D_MODEL)
    assert jnp.all(jnp.isfinite(out))
    print("KERNEL_OK")
</pallas_src>

<mosaic_0001>
module attributes {stable_mosaic.version = 11 : i64} {
  func.func @_dit_block_kernel(%arg0: memref<16x32xf32, #tpu.memory_space<vmem>>, %arg1: memref<2x32xf32, #tpu.memory_space<vmem>>, %arg2: memref<6x32x32xf32, #tpu.memory_space<vmem>>, %arg3: memref<6x1x32xf32, #tpu.memory_space<vmem>>, %arg4: memref<16x2xf32, #tpu.memory_space<vmem>>, %arg5: memref<32x32xf32, #tpu.memory_space<vmem>>, %arg6: memref<32x32xf32, #tpu.memory_space<vmem>>, %arg7: memref<32x32xf32, #tpu.memory_space<vmem>>, %arg8: memref<1x32xf32, #tpu.memory_space<vmem>>, %arg9: memref<16x32xf32, #tpu.memory_space<vmem>>, %arg10: memref<16x32xf32, #tpu.memory_space<vmem>>, %arg11: memref<32x32xf32, #tpu.memory_space<vmem>>, %arg12: memref<32x32xf32, #tpu.memory_space<vmem>>, %arg13: memref<4x1x32xf32, #tpu.memory_space<vmem>>, %arg14: memref<16x16xf32, #tpu.memory_space<vmem>>, %arg15: memref<16x16xf32, #tpu.memory_space<vmem>>, %arg16: memref<32x32xf32, #tpu.memory_space<vmem>>, %arg17: memref<1x32xf32, #tpu.memory_space<vmem>>, %arg18: memref<1x32xf32, #tpu.memory_space<vmem>>, %arg19: memref<32x128xf32, #tpu.memory_space<vmem>>, %arg20: memref<1x128xf32, #tpu.memory_space<vmem>>, %arg21: memref<128x32xf32, #tpu.memory_space<vmem>>, %arg22: memref<1x32xf32, #tpu.memory_space<vmem>>, %arg23: memref<1x32xf32, #tpu.memory_space<vmem>>, %arg24: memref<16x32xf32, #tpu.memory_space<vmem>>) attributes {dimension_semantics = [], scalar_prefetch = 0 : i64, scratch_operands = 0 : i64, tpu.core_type = #tpu.core_type<tc>} {
    %c0 = arith.constant 0 : index
    %c0_0 = arith.constant 0 : index
    %0 = vector.load %arg0[%c0, %c0_0] : memref<16x32xf32, #tpu.memory_space<vmem>>, vector<16x32xf32>
    %c0_1 = arith.constant 0 : index
    %c0_2 = arith.constant 0 : index
    %1 = vector.load %arg1[%c0_1, %c0_2] : memref<2x32xf32, #tpu.memory_space<vmem>>, vector<2x32xf32>
    %c0_3 = arith.constant 0 : index
    %c0_4 = arith.constant 0 : index
    %2 = vector.load %arg4[%c0_3, %c0_4] : memref<16x2xf32, #tpu.memory_space<vmem>>, vector<16x2xf32>
    %c0_5 = arith.constant 0 : index
    %c0_6 = arith.constant 0 : index
    %3 = vector.load %arg12[%c0_5, %c0_6] : memref<32x32xf32, #tpu.memory_space<vmem>>, vector<32x32xf32>
    %c0_7 = arith.constant 0 : index
    %c0_8 = arith.constant 0 : index
    %4 = vector.load %arg14[%c0_7, %c0_8] : memref<16x16xf32, #tpu.memory_space<vmem>>, vector<16x16xf32>
    %c0_9 = arith.constant 0 : index
    %c0_10 = arith.constant 0 : index
    %5 = vector.load %arg15[%c0_9, %c0_10] : memref<16x16xf32, #tpu.memory_space<vmem>>, vector<16x16xf32>
    %cst = arith.constant 0.000000e+00 : f32
    %6 = vector.broadcast %cst : f32 to vector<2x32xf32>
    %7 = arith.subf %6, %1 : vector<2x32xf32>
    %8 = math.exp %7 : vector<2x32xf32>
    %cst_11 = arith.constant 1.000000e+00 : f32
    %9 = vector.broadcast %cst_11 : f32 to vector<2x32xf32>
    %10 = arith.addf %9, %8 : vector<2x32xf32>
    %cst_12 = arith.constant 1.000000e+00 : f32
    %11 = vector.broadcast %cst_12 : f32 to vector<2x32xf32>
    %12 = arith.divf %11, %10 : vector<2x32xf32>
    %13 = arith.mulf %1, %12 : vector<2x32xf32>
    %cst_13 = arith.constant dense<0.000000e+00> : vector<16x32xf32>
    %14 = tpu.matmul %2, %13, %cst_13 {dimension_numbers = #tpu.dot_dimension_numbers<[1], [0], [0], [1], [0, 0, 1, 1], [], []>} : vector<16x2xf32>, vector<2x32xf32>, vector<16x32xf32> -> vector<16x32xf32>
    %c0_14 = arith.constant 0 : index
    %c0_15 = arith.constant 0 : index
    %c0_16 = arith.constant 0 : index
    %15 = vector.load %arg2[%c0_14, %c0_15, %c0_16] : memref<6x32x32xf32, #tpu.memory_space<vmem>>, vector<1x32x32xf32>
    %16 = vector.shape_cast %15 : vector<1x32x32xf32> to vector<32x32xf32>
    %cst_17 = arith.constant dense<0.000000e+00> : vector<16x32xf32>
    %17 = tpu.matmul %14, %16, %cst_17 {dimension_numbers = #tpu.dot_dimension_numbers<[1], [0], [0], [1], [0, 0, 1, 1], [], []>} : vector<16x32xf32>, vector<32x32xf32>, vector<16x32xf32> -> vector<16x32xf32>
    %c0_18 = arith.constant 0 : index
    %c0_19 = arith.constant 0 : index
    %c0_20 = arith.constant 0 : index
    %18 = vector.load %arg3[%c0_18, %c0_19, %c0_20] : memref<6x1x32xf32, #tpu.memory_space<vmem>>, vector<1x1x32xf32>
    %19 = vector.shape_cast %18 : vector<1x1x32xf32> to vector<1x32xf32>
    %20 = vector.broadcast %19 : vector<1x32xf32> to vector<16x32xf32>
    %21 = arith.addf %17, %20 : vector<16x32xf32>
    %c1 = arith.constant 1 : index
    %c0_21 = arith.constant 0 : index
    %c0_22 = arith.constant 0 : index
    %22 = vector.load %arg2[%c1, %c0_21, %c0_22] : memref<6x32x32xf32, #tpu.memory_space<vmem>>, vector<1x32x32xf32>
    %23 = vector.shape_cast %22 : vector<1x32x32xf32> to vector<32x32xf32>
    %cst_23 = arith.constant dense<0.000000e+00> : vector<16x32xf32>
    %24 = tpu.matmul %14, %23, %cst_23 {dimension_numbers = #tpu.dot_dimension_numbers<[1], [0], [0], [1], [0, 0, 1, 1], [], []>} : vector<16x32xf32>, vector<32x32xf32>, vector<16x32xf32> -> vector<16x32xf32>
    %c1_24 = arith.constant 1 : index
    %c0_25 = arith.constant 0 : index
    %c0_26 = arith.constant 0 : index
    %25 = vector.load %arg3[%c1_24, %c0_25, %c0_26] : memref<6x1x32xf32, #tpu.memory_space<vmem>>, vector<1x1x32xf32>
    %26 = vector.shape_cast %25 : vector<1x1x32xf32> to vector<1x32xf32>
    %27 = vector.broadcast %26 : vector<1x32xf32> to vector<16x32xf32>
    %28 = arith.addf %24, %27 : vector<16x32xf32>
    %c2 = arith.constant 2 : index
    %c0_27 = arith.constant 0 : index
    %c0_28 = arith.constant 0 : index
    %29 = vector.load %arg2[%c2, %c0_27, %c0_28] : memref<6x32x32xf32, #tpu.memory_space<vmem>>, vector<1x32x32xf32>
    %30 = vector.shape_cast %29 : vector<1x32x32xf32> to vector<32x32xf32>
    %cst_29 = arith.constant dense<0.000000e+00> : vector<16x32xf32>
    %31 = tpu.matmul %14, %30, %cst_29 {dimension_numbers = #tpu.dot_dimension_numbers<[1], [0], [0], [1], [0, 0, 1, 1], [], []>} : vector<16x32xf32>, vector<32x32xf32>, vector<16x32xf32> -> vector<16x32xf32>
    %c2_30 = arith.constant 2 : index
    %c0_31 = arith.constant 0 : index
    %c0_32 = arith.constant 0 : index
    %32 = vector.load %arg3[%c2_30, %c0_31, %c0_32] : memref<6x1x32xf32, #tpu.memory_space<vmem>>, vector<1x1x32xf32>
    %33 = vector.shape_cast %32 : vector<1x1x32xf32> to vector<1x32xf32>
    %34 = vector.broadcast %33 : vector<1x32xf32> to vector<16x32xf32>
    %35 = arith.addf %31, %34 : vector<16x32xf32>
    %c3 = arith.constant 3 : index
    %c0_33 = arith.constant 0 : index
    %c0_34 = arith.constant 0 : index
    %36 = vector.load %arg2[%c3, %c0_33, %c0_34] : memref<6x32x32xf32, #tpu.memory_space<vmem>>, vector<1x32x32xf32>
    %37 = vector.shape_cast %36 : vector<1x32x32xf32> to vector<32x32xf32>
    %cst_35 = arith.constant dense<0.000000e+00> : vector<16x32xf32>
    %38 = tpu.matmul %14, %37, %cst_35 {dimension_numbers = #tpu.dot_dimension_numbers<[1], [0], [0], [1], [0, 0, 1, 1], [], []>} : vector<16x32xf32>, vector<32x32xf32>, vector<16x32xf32> -> vector<16x32xf32>
    %c3_36 = arith.constant 3 : index
    %c0_37 = arith.constant 0 : index
    %c0_38 = arith.constant 0 : index
    %39 = vector.load %arg3[%c3_36, %c0_37, %c0_38] : memref<6x1x32xf32, #tpu.memory_space<vmem>>, vector<1x1x32xf32>
    %40 = vector.shape_cast %39 : vector<1x1x32xf32> to vector<1x32xf32>
    %41 = vector.broadcast %40 : vector<1x32xf32> to vector<16x32xf32>
    %42 = arith.addf %38, %41 : vector<16x32xf32>
    %c4 = arith.constant 4 : index
    %c0_39 = arith.constant 0 : index
    %c0_40 = arith.constant 0 : index
    %43 = vector.load %arg2[%c4, %c0_39, %c0_40] : memref<6x32x32xf32, #tpu.memory_space<vmem>>, vector<1x32x32xf32>
    %44 = vector.shape_cast %43 : vector<1x32x32xf32> to vector<32x32xf32>
    %cst_41 = arith.constant dense<0.000000e+00> : vector<16x32xf32>
    %45 = tpu.matmul %14, %44, %cst_41 {dimension_numbers = #tpu.dot_dimension_numbers<[1], [0], [0], [1], [0, 0, 1, 1], [], []>} : vector<16x32xf32>, vector<32x32xf32>, vector<16x32xf32> -> vector<16x32xf32>
    %c4_42 = arith.constant 4 : index
    %c0_43 = arith.constant 0 : index
    %c0_44 = arith.constant 0 : index
    %46 = vector.load %arg3[%c4_42, %c0_43, %c0_44] : memref<6x1x32xf32, #tpu.memory_space<vmem>>, vector<1x1x32xf32>
    %47 = vector.shape_cast %46 : vector<1x1x32xf32> to vector<1x32xf32>
    %48 = vector.broadcast %47 : vector<1x32xf32> to vector<16x32xf32>
    %49 = arith.addf %45, %48 : vector<16x32xf32>
    %c5 = arith.constant 5 : index
    %c0_45 = arith.constant 0 : index
    %c0_46 = arith.constant 0 : index
    %50 = vector.load %arg2[%c5, %c0_45, %c0_46] : memref<6x32x32xf32, #tpu.memory_space<vmem>>, vector<1x32x32xf32>
    %51 = vector.shape_cast %50 : vector<1x32x32xf32> to vector<32x32xf32>
    %cst_47 = arith.constant dense<0.000000e+00> : vector<16x32xf32>
    %52 = tpu.matmul %14, %51, %cst_47 {dimension_numbers = #tpu.dot_dimension_numbers<[1], [0], [0], [1], [0, 0, 1, 1], [], []>} : vector<16x32xf32>, vector<32x32xf32>, vector<16x32xf32> -> vector<16x32xf32>
    %c5_48 = arith.constant 5 : index
    %c0_49 = arith.constant 0 : index
    %c0_50 = arith.constant 0 : index
    %53 = vector.load %arg3[%c5_48, %c0_49, %c0_50] : memref<6x1x32xf32, #tpu.memory_space<vmem>>, vector<1x1x32xf32>
    %54 = vector.shape_cast %53 : vector<1x1x32xf32> to vector<1x32xf32>
    %55 = vector.broadcast %54 : vector<1x32xf32> to vector<16x32xf32>
    %56 = arith.addf %52, %55 : vector<16x32xf32>
    %cst_51 = arith.constant 1.000000e+00 : f32
    %57 = vector.broadcast %cst_51 : f32 to vector<16x32xf32>
    %58 = arith.addf %57, %28 : vector<16x32xf32>
    %59 = arith.mulf %0, %58 : vector<16x32xf32>
    %60 = arith.addf %59, %21 : vector<16x32xf32>
    %c0_52 = arith.constant 0 : index
    %c0_53 = arith.constant 0 : index
    %61 = vector.load %arg5[%c0_52, %c0_53] : memref<32x32xf32, #tpu.memory_space<vmem>>, vector<32x32xf32>
    %cst_54 = arith.constant dense<0.000000e+00> : vector<16x32xf32>
    %62 = tpu.matmul %60, %61, %cst_54 {dimension_numbers = #tpu.dot_dimension_numbers<[1], [0], [0], [1], [0, 0, 1, 1], [], []>} : vector<16x32xf32>, vector<32x32xf32>, vector<16x32xf32> -> vector<16x32xf32>
    %c0_55 = arith.constant 0 : index
    %c0_56 = arith.constant 0 : index
    %63 = vector.load %arg6[%c0_55, %c0_56] : memref<32x32xf32, #tpu.memory_space<vmem>>, vector<32x32xf32>
    %cst_57 = arith.constant dense<0.000000e+00> : vector<16x32xf32>
    %64 = tpu.matmul %60, %63, %cst_57 {dimension_numbers = #tpu.dot_dimension_numbers<[1], [0], [0], [1], [0, 0, 1, 1], [], []>} : vector<16x32xf32>, vector<32x32xf32>, vector<16x32xf32> -> vector<16x32xf32>
    %c0_58 = arith.constant 0 : index
    %c0_59 = arith.constant 0 : index
    %65 = vector.load %arg7[%c0_58, %c0_59] : memref<32x32xf32, #tpu.memory_space<vmem>>, vector<32x32xf32>
    %cst_60 = arith.constant dense<0.000000e+00> : vector<16x32xf32>
    %66 = tpu.matmul %60, %65, %cst_60 {dimension_numbers = #tpu.dot_dimension_numbers<[1], [0], [0], [1], [0, 0, 1, 1], [], []>} : vector<16x32xf32>, vector<32x32xf32>, vector<16x32xf32> -> vector<16x32xf32>
    %c0_61 = arith.constant 0 : index
    %c0_62 = arith.constant 0 : index
    %67 = vector.load %arg8[%c0_61, %c0_62] : memref<1x32xf32, #tpu.memory_space<vmem>>, vector<1x32xf32>
    %68 = arith.mulf %62, %62 : vector<16x32xf32>
    %cst_63 = arith.constant dense<0.000000e+00> : vector<16x32xf32>
    %69 = tpu.matmul %68, %3, %cst_63 {dimension_numbers = #tpu.dot_dimension_numbers<[1], [0], [0], [1], [0, 0, 1, 1], [], []>} : vector<16x32xf32>, vector<32x32xf32>, vector<16x32xf32> -> vector<16x32xf32>
    %cst_64 = arith.constant 1.000000e-24 : f32
    %70 = vector.broadcast %cst_64 : f32 to vector<16x32xf32>
    %71 = arith.maximumf %69, %70 : vector<16x32xf32>
    %72 = math.rsqrt %71 : vector<16x32xf32>
    %73 = arith.mulf %62, %72 : vector<16x32xf32>
    %74 = vector.broadcast %67 : vector<1x32xf32> to vector<16x32xf32>
    %75 = arith.mulf %73, %74 : vector<16x32xf32>
    %76 = arith.mulf %64, %64 : vector<16x32xf32>
    %cst_65 = arith.constant dense<0.000000e+00> : vector<16x32xf32>
    %77 = tpu.matmul %76, %3, %cst_65 {dimension_numbers = #tpu.dot_dimension_numbers<[1], [0], [0], [1], [0, 0, 1, 1], [], []>} : vector<16x32xf32>, vector<32x32xf32>, vector<16x32xf32> -> vector<16x32xf32>
    %cst_66 = arith.constant 1.000000e-24 : f32
    %78 = vector.broadcast %cst_66 : f32 to vector<16x32xf32>
    %79 = arith.maximumf %77, %78 : vector<16x32xf32>
    %80 = math.rsqrt %79 : vector<16x32xf32>
    %81 = arith.mulf %64, %80 : vector<16x32xf32>
    %82 = vector.broadcast %67 : vector<1x32xf32> to vector<16x32xf32>
    %83 = arith.mulf %81, %82 : vector<16x32xf32>
    %c0_67 = arith.constant 0 : index
    %c0_68 = arith.constant 0 : index
    %84 = vector.load %arg9[%c0_67, %c0_68] : memref<16x32xf32, #tpu.memory_space<vmem>>, vector<16x32xf32>
    %c0_69 = arith.constant 0 : index
    %c0_70 = arith.constant 0 : index
    %85 = vector.load %arg10[%c0_69, %c0_70] : memref<16x32xf32, #tpu.memory_space<vmem>>, vector<16x32xf32>
    %c0_71 = arith.constant 0 : index
    %c0_72 = arith.constant 0 : index
    %86 = vector.load %arg11[%c0_71, %c0_72] : memref<32x32xf32, #tpu.memory_space<vmem>>, vector<32x32xf32>
    %87 = arith.mulf %75, %84 : vector<16x32xf32>
    %cst_73 = arith.constant dense<0.000000e+00> : vector<16x32xf32>
    %88 = tpu.matmul %75, %86, %cst_73 {dimension_numbers = #tpu.dot_dimension_numbers<[1], [0], [0], [1], [0, 0, 1, 1], [], []>} : vector<16x32xf32>, vector<32x32xf32>, vector<16x32xf32> -> vector<16x32xf32>
    %89 = arith.mulf %88, %85 : vector<16x32xf32>
    %90 = arith.addf %87, %89 : vector<16x32xf32>
    %91 = arith.mulf %83, %84 : vector<16x32xf32>
    %cst_74 = arith.constant dense<0.000000e+00> : vector<16x32xf32>
    %92 = tpu.matmul %83, %86, %cst_74 {dimension_numbers = #tpu.dot_dimension_numbers<[1], [0], [0], [1], [0, 0, 1, 1], [], []>} : vector<16x32xf32>, vector<32x32xf32>, vector<16x32xf32> -> vector<16x32xf32>
    %93 = arith.mulf %92, %85 : vector<16x32xf32>
    %94 = arith.addf %91, %93 : vector<16x32xf32>
    %cst_75 = arith.constant 0.000000e+00 : f32
    %95 = vector.broadcast %cst_75 : f32 to vector<16x32xf32>
    %c0_76 = arith.constant 0 : index
    %c0_77 = arith.constant 0 : index
    %c0_78 = arith.constant 0 : index
    %96 = vector.load %arg13[%c0_76, %c0_77, %c0_78] : memref<4x1x32xf32, #tpu.memory_space<vmem>>, vector<1x1x32xf32>
    %97 = vector.shape_cast %96 : vector<1x1x32xf32> to vector<1x32xf32>
    %98 = vector.broadcast %97 : vector<1x32xf32> to vector<16x32xf32>
    %99 = arith.mulf %90, %98 : vector<16x32xf32>
    %100 = vector.broadcast %97 : vector<1x32xf32> to vector<16x32xf32>
    %101 = arith.mulf %94, %100 : vector<16x32xf32>
    %102 = vector.broadcast %97 : vector<1x32xf32> to vector<16x32xf32>
    %103 = arith.mulf %66, %102 : vector<16x32xf32>
    %cst_79 = arith.constant dense<0.000000e+00> : vector<16x16xf32>
    %104 = tpu.matmul %99, %101, %cst_79 {dimension_numbers = #tpu.dot_dimension_numbers<[1], [1], [0], [0], [0, 0, 1, 0], [], []>} : vector<16x32xf32>, vector<16x32xf32>, vector<16x16xf32> -> vector<16x16xf32>
    %cst_80 = arith.constant 2.82842708 : f32
    %105 = vector.broadcast %cst_80 : f32 to vector<16x16xf32>
    %106 = arith.mulf %104, %105 : vector<16x16xf32>
    %107 = arith.addf %106, %5 : vector<16x16xf32>
    %cst_81 = arith.constant dense<0xFF800000> : vector<16xf32>
    %108 = vector.multi_reduction <maximumf>, %107, %cst_81 [1] : vector<16x16xf32> to vector<16xf32>
    %109 = vector.shape_cast %108 : vector<16xf32> to vector<16x1xf32>
    %110 = vector.broadcast %109 : vector<16x1xf32> to vector<16x16xf32>
    %111 = arith.subf %107, %110 : vector<16x16xf32>
    %112 = math.exp %111 : vector<16x16xf32>
    %cst_82 = arith.constant dense<0.000000e+00> : vector<16xf32>
    %113 = vector.multi_reduction <add>, %112, %cst_82 [1] : vector<16x16xf32> to vector<16xf32>
    %114 = vector.shape_cast %113 : vector<16xf32> to vector<16x1xf32>
    %115 = tpu.reciprocal %114 {approx = true} : vector<16x1xf32> -> vector<16x1xf32>
    %116 = vector.broadcast %115 : vector<16x1xf32> to vector<16x16xf32>
    %117 = arith.mulf %112, %116 : vector<16x16xf32>
    %cst_83 = arith.constant dense<0.000000e+00> : vector<16xf32>
    %118 = vector.multi_reduction <add>, %117, %cst_83 [0] : vector<16x16xf32> to vector<16xf32>
    %119 = vector.shape_cast %118 : vector<16xf32> to vector<1x16xf32>
    %120 = vector.broadcast %119 : vector<1x16xf32> to vector<16x16xf32>
    %121 = arith.mulf %4, %120 : vector<16x16xf32>
    %cst_84 = arith.constant dense<0.000000e+00> : vector<16x32xf32>
    %122 = tpu.matmul %121, %103, %cst_84 {dimension_numbers = #tpu.dot_dimension_numbers<[1], [0], [0], [1], [0, 0, 1, 1], [], []>} : vector<16x16xf32>, vector<16x32xf32>, vector<16x32xf32> -> vector<16x32xf32>
    %123 = arith.addf %95, %122 : vector<16x32xf32>
    %c1_85 = arith.constant 1 : index
    %c0_86 = arith.constant 0 : index
    %c0_87 = arith.constant 0 : index
    %124 = vector.load %arg13[%c1_85, %c0_86, %c0_87] : memref<4x1x32xf32, #tpu.memory_space<vmem>>, vector<1x1x32xf32>
    %125 = vector.shape_cast %124 : vector<1x1x32xf32> to vector<1x32xf32>
    %126 = vector.broadcast %125 : vector<1x32xf32> to vector<16x32xf32>
    %127 = arith.mulf %90, %126 : vector<16x32xf32>
    %128 = vector.broadcast %125 : vector<1x32xf32> to vector<16x32xf32>
    %129 = arith.mulf %94, %128 : vector<16x32xf32>
    %130 = vector.broadcast %125 : vector<1x32xf32> to vector<16x32xf32>
    %131 = arith.mulf %66, %130 : vector<16x32xf32>
    %cst_88 = arith.constant dense<0.000000e+00> : vector<16x16xf32>
    %132 = tpu.matmul %127, %129, %cst_88 {dimension_numbers = #tpu.dot_dimension_numbers<[1], [1], [0], [0], [0, 0, 1, 0], [], []>} : vector<16x32xf32>, vector<16x32xf32>, vector<16x16xf32> -> vector<16x16xf32>
    %cst_89 = arith.constant 2.82842708 : f32
    %133 = vector.broadcast %cst_89 : f32 to vector<16x16xf32>
    %134 = arith.mulf %132, %133 : vector<16x16xf32>
    %135 = arith.addf %134, %5 : vector<16x16xf32>
    %cst_90 = arith.constant dense<0xFF800000> : vector<16xf32>
    %136 = vector.multi_reduction <maximumf>, %135, %cst_90 [1] : vector<16x16xf32> to vector<16xf32>
    %137 = vector.shape_cast %136 : vector<16xf32> to vector<16x1xf32>
    %138 = vector.broadcast %137 : vector<16x1xf32> to vector<16x16xf32>
    %139 = arith.subf %135, %138 : vector<16x16xf32>
    %140 = math.exp %139 : vector<16x16xf32>
    %cst_91 = arith.constant dense<0.000000e+00> : vector<16xf32>
    %141 = vector.multi_reduction <add>, %140, %cst_91 [1] : vector<16x16xf32> to vector<16xf32>
    %142 = vector.shape_cast %141 : vector<16xf32> to vector<16x1xf32>
    %143 = tpu.reciprocal %142 {approx = true} : vector<16x1xf32> -> vector<16x1xf32>
    %144 = vector.broadcast %143 : vector<16x1xf32> to vector<16x16xf32>
    %145 = arith.mulf %140, %144 : vector<16x16xf32>
    %cst_92 = arith.constant dense<0.000000e+00> : vector<16xf32>
    %146 = vector.multi_reduction <add>, %145, %cst_92 [0] : vector<16x16xf32> to vector<16xf32>
    %147 = vector.shape_cast %146 : vector<16xf32> to vector<1x16xf32>
    %148 = vector.broadcast %147 : vector<1x16xf32> to vector<16x16xf32>
    %149 = arith.mulf %4, %148 : vector<16x16xf32>
    %cst_93 = arith.constant dense<0.000000e+00> : vector<16x32xf32>
    %150 = tpu.matmul %149, %131, %cst_93 {dimension_numbers = #tpu.dot_dimension_numbers<[1], [0], [0], [1], [0, 0, 1, 1], [], []>} : vector<16x16xf32>, vector<16x32xf32>, vector<16x32xf32> -> vector<16x32xf32>
    %151 = arith.addf %123, %150 : vector<16x32xf32>
    %c2_94 = arith.constant 2 : index
    %c0_95 = arith.constant 0 : index
    %c0_96 = arith.constant 0 : index
    %152 = vector.load %arg13[%c2_94, %c0_95, %c0_96] : memref<4x1x32xf32, #tpu.memory_space<vmem>>, vector<1x1x32xf32>
    %153 = vector.shape_cast %152 : vector<1x1x32xf32> to vector<1x32xf32>
    %154 = vector.broadcast %153 : vector<1x32xf32> to vector<16x32xf32>
    %155 = arith.mulf %90, %154 : vector<16x32xf32>
    %156 = vector.broadcast %153 : vector<1x32xf32> to vector<16x32xf32>
    %157 = arith.mulf %94, %156 : vector<16x32xf32>
    %158 = vector.broadcast %153 : vector<1x32xf32> to vector<16x32xf32>
    %159 = arith.mulf %66, %158 : vector<16x32xf32>
    %cst_97 = arith.constant dense<0.000000e+00> : vector<16x16xf32>
    %160 = tpu.matmul %155, %157, %cst_97 {dimension_numbers = #tpu.dot_dimension_numbers<[1], [1], [0], [0], [0, 0, 1, 0], [], []>} : vector<16x32xf32>, vector<16x32xf32>, vector<16x16xf32> -> vector<16x16xf32>
    %cst_98 = arith.constant 2.82842708 : f32
    %161 = vector.broadcast %cst_98 : f32 to vector<16x16xf32>
    %162 = arith.mulf %160, %161 : vector<16x16xf32>
    %163 = arith.addf %162, %5 : vector<16x16xf32>
    %cst_99 = arith.constant dense<0xFF800000> : vector<16xf32>
    %164 = vector.multi_reduction <maximumf>, %163, %cst_99 [1] : vector<16x16xf32> to vector<16xf32>
    %165 = vector.shape_cast %164 : vector<16xf32> to vector<16x1xf32>
    %166 = vector.broadcast %165 : vector<16x1xf32> to vector<16x16xf32>
    %167 = arith.subf %163, %166 : vector<16x16xf32>
    %168 = math.exp %167 : vector<16x16xf32>
    %cst_100 = arith.constant dense<0.000000e+00> : vector<16xf32>
    %169 = vector.multi_reduction <add>, %168, %cst_100 [1] : vector<16x16xf32> to vector<16xf32>
    %170 = vector.shape_cast %169 : vector<16xf32> to vector<16x1xf32>
    %171 = tpu.reciprocal %170 {approx = true} : vector<16x1xf32> -> vector<16x1xf32>
    %172 = vector.broadcast %171 : vector<16x1xf32> to vector<16x16xf32>
    %173 = arith.mulf %168, %172 : vector<16x16xf32>
    %cst_101 = arith.constant dense<0.000000e+00> : vector<16xf32>
    %174 = vector.multi_reduction <add>, %173, %cst_101 [0] : vector<16x16xf32> to vector<16xf32>
    %175 = vector.shape_cast %174 : vector<16xf32> to vector<1x16xf32>
    %176 = vector.broadcast %175 : vector<1x16xf32> to vector<16x16xf32>
    %177 = arith.mulf %4, %176 : vector<16x16xf32>
    %cst_102 = arith.constant dense<0.000000e+00> : vector<16x32xf32>
    %178 = tpu.matmul %177, %159, %cst_102 {dimension_numbers = #tpu.dot_dimension_numbers<[1], [0], [0], [1], [0, 0, 1, 1], [], []>} : vector<16x16xf32>, vector<16x32xf32>, vector<16x32xf32> -> vector<16x32xf32>
    %179 = arith.addf %151, %178 : vector<16x32xf32>
    %c3_103 = arith.constant 3 : index
    %c0_104 = arith.constant 0 : index
    %c0_105 = arith.constant 0 : index
    %180 = vector.load %arg13[%c3_103, %c0_104, %c0_105] : memref<4x1x32xf32, #tpu.memory_space<vmem>>, vector<1x1x32xf32>
    %181 = vector.shape_cast %180 : vector<1x1x32xf32> to vector<1x32xf32>
    %182 = vector.broadcast %181 : vector<1x32xf32> to vector<16x32xf32>
    %183 = arith.mulf %90, %182 : vector<16x32xf32>
    %184 = vector.broadcast %181 : vector<1x32xf32> to vector<16x32xf32>
    %185 = arith.mulf %94, %184 : vector<16x32xf32>
    %186 = vector.broadcast %181 : vector<1x32xf32> to vector<16x32xf32>
    %187 = arith.mulf %66, %186 : vector<16x32xf32>
    %cst_106 = arith.constant dense<0.000000e+00> : vector<16x16xf32>
    %188 = tpu.matmul %183, %185, %cst_106 {dimension_numbers = #tpu.dot_dimension_numbers<[1], [1], [0], [0], [0, 0, 1, 0], [], []>} : vector<16x32xf32>, vector<16x32xf32>, vector<16x16xf32> -> vector<16x16xf32>
    %cst_107 = arith.constant 2.82842708 : f32
    %189 = vector.broadcast %cst_107 : f32 to vector<16x16xf32>
    %190 = arith.mulf %188, %189 : vector<16x16xf32>
    %191 = arith.addf %190, %5 : vector<16x16xf32>
    %cst_108 = arith.constant dense<0xFF800000> : vector<16xf32>
    %192 = vector.multi_reduction <maximumf>, %191, %cst_108 [1] : vector<16x16xf32> to vector<16xf32>
    %193 = vector.shape_cast %192 : vector<16xf32> to vector<16x1xf32>
    %194 = vector.broadcast %193 : vector<16x1xf32> to vector<16x16xf32>
    %195 = arith.subf %191, %194 : vector<16x16xf32>
    %196 = math.exp %195 : vector<16x16xf32>
    %cst_109 = arith.constant dense<0.000000e+00> : vector<16xf32>
    %197 = vector.multi_reduction <add>, %196, %cst_109 [1] : vector<16x16xf32> to vector<16xf32>
    %198 = vector.shape_cast %197 : vector<16xf32> to vector<16x1xf32>
    %199 = tpu.reciprocal %198 {approx = true} : vector<16x1xf32> -> vector<16x1xf32>
    %200 = vector.broadcast %199 : vector<16x1xf32> to vector<16x16xf32>
    %201 = arith.mulf %196, %200 : vector<16x16xf32>
    %cst_110 = arith.constant dense<0.000000e+00> : vector<16xf32>
    %202 = vector.multi_reduction <add>, %201, %cst_110 [0] : vector<16x16xf32> to vector<16xf32>
    %203 = vector.shape_cast %202 : vector<16xf32> to vector<1x16xf32>
    %204 = vector.broadcast %203 : vector<1x16xf32> to vector<16x16xf32>
    %205 = arith.mulf %4, %204 : vector<16x16xf32>
    %cst_111 = arith.constant dense<0.000000e+00> : vector<16x32xf32>
    %206 = tpu.matmul %205, %187, %cst_111 {dimension_numbers = #tpu.dot_dimension_numbers<[1], [0], [0], [1], [0, 0, 1, 1], [], []>} : vector<16x16xf32>, vector<16x32xf32>, vector<16x32xf32> -> vector<16x32xf32>
    %207 = arith.addf %179, %206 : vector<16x32xf32>
    %c0_112 = arith.constant 0 : index
    %c0_113 = arith.constant 0 : index
    %208 = vector.load %arg16[%c0_112, %c0_113] : memref<32x32xf32, #tpu.memory_space<vmem>>, vector<32x32xf32>
    %cst_114 = arith.constant dense<0.000000e+00> : vector<16x32xf32>
    %209 = tpu.matmul %207, %208, %cst_114 {dimension_numbers = #tpu.dot_dimension_numbers<[1], [0], [0], [1], [0, 0, 1, 1], [], []>} : vector<16x32xf32>, vector<32x32xf32>, vector<16x32xf32> -> vector<16x32xf32>
    %c0_115 = arith.constant 0 : index
    %c0_116 = arith.constant 0 : index
    %210 = vector.load %arg17[%c0_115, %c0_116] : memref<1x32xf32, #tpu.memory_space<vmem>>, vector<1x32xf32>
    %211 = vector.broadcast %210 : vector<1x32xf32> to vector<16x32xf32>
    %212 = arith.addf %209, %211 : vector<16x32xf32>
    %213 = arith.mulf %212, %212 : vector<16x32xf32>
    %cst_117 = arith.constant dense<0.000000e+00> : vector<16xf32>
    %214 = vector.multi_reduction <add>, %213, %cst_117 [1] : vector<16x32xf32> to vector<16xf32>
    %215 = vector.shape_cast %214 : vector<16xf32> to vector<16x1xf32>
    %cst_118 = arith.constant 1.000000e-24 : f32
    %216 = vector.broadcast %cst_118 : f32 to vector<16x1xf32>
    %217 = arith.maximumf %215, %216 : vector<16x1xf32>
    %218 = math.rsqrt %217 : vector<16x1xf32>
    %219 = vector.broadcast %218 : vector<16x1xf32> to vector<16x32xf32>
    %220 = arith.mulf %212, %219 : vector<16x32xf32>
    %221 = arith.mulf %35, %220 : vector<16x32xf32>
    %c0_119 = arith.constant 0 : index
    %c0_120 = arith.constant 0 : index
    %222 = vector.load %arg18[%c0_119, %c0_120] : memref<1x32xf32, #tpu.memory_space<vmem>>, vector<1x32xf32>
    %223 = arith.subf %221, %0 : vector<16x32xf32>
    %224 = vector.broadcast %222 : vector<1x32xf32> to vector<16x32xf32>
    %225 = arith.mulf %224, %223 : vector<16x32xf32>
    %226 = arith.addf %0, %225 : vector<16x32xf32>
    %227 = arith.mulf %226, %226 : vector<16x32xf32>
    %cst_121 = arith.constant dense<0.000000e+00> : vector<16xf32>
    %228 = vector.multi_reduction <add>, %227, %cst_121 [1] : vector<16x32xf32> to vector<16xf32>
    %229 = vector.shape_cast %228 : vector<16xf32> to vector<16x1xf32>
    %cst_122 = arith.constant 1.000000e-24 : f32
    %230 = vector.broadcast %cst_122 : f32 to vector<16x1xf32>
    %231 = arith.maximumf %229, %230 : vector<16x1xf32>
    %232 = math.rsqrt %231 : vector<16x1xf32>
    %233 = vector.broadcast %232 : vector<16x1xf32> to vector<16x32xf32>
    %234 = arith.mulf %226, %233 : vector<16x32xf32>
    %cst_123 = arith.constant 1.000000e+00 : f32
    %235 = vector.broadcast %cst_123 : f32 to vector<16x32xf32>
    %236 = arith.addf %235, %49 : vector<16x32xf32>
    %237 = arith.mulf %234, %236 : vector<16x32xf32>
    %238 = arith.addf %237, %42 : vector<16x32xf32>
    %c0_124 = arith.constant 0 : index
    %c0_125 = arith.constant 0 : index
    %239 = vector.load %arg19[%c0_124, %c0_125] : memref<32x128xf32, #tpu.memory_space<vmem>>, vector<32x128xf32>
    %cst_126 = arith.constant dense<0.000000e+00> : vector<16x128xf32>
    %240 = tpu.matmul %238, %239, %cst_126 {dimension_numbers = #tpu.dot_dimension_numbers<[1], [0], [0], [1], [0, 0, 1, 1], [], []>} : vector<16x32xf32>, vector<32x128xf32>, vector<16x128xf32> -> vector<16x128xf32>
    %c0_127 = arith.constant 0 : index
    %c0_128 = arith.constant 0 : index
    %241 = vector.load %arg20[%c0_127, %c0_128] : memref<1x128xf32, #tpu.memory_space<vmem>>, vector<1x128xf32>
    %242 = vector.broadcast %241 : vector<1x128xf32> to vector<16x128xf32>
    %243 = arith.addf %240, %242 : vector<16x128xf32>
    %244 = arith.mulf %243, %243 : vector<16x128xf32>
    %245 = arith.mulf %243, %244 : vector<16x128xf32>
    %cst_129 = arith.constant 4.471500e-02 : f32
    %246 = vector.broadcast %cst_129 : f32 to vector<16x128xf32>
    %247 = arith.mulf %246, %245 : vector<16x128xf32>
    %248 = arith.addf %243, %247 : vector<16x128xf32>
    %cst_130 = arith.constant 0.797884583 : f32
    %249 = vector.broadcast %cst_130 : f32 to vector<16x128xf32>
    %250 = arith.mulf %249, %248 : vector<16x128xf32>
    %251 = math.tanh %250 : vector<16x128xf32>
    %cst_131 = arith.constant 1.000000e+00 : f32
    %252 = vector.broadcast %cst_131 : f32 to vector<16x128xf32>
    %253 = arith.addf %252, %251 : vector<16x128xf32>
    %cst_132 = arith.constant 5.000000e-01 : f32
    %254 = vector.broadcast %cst_132 : f32 to vector<16x128xf32>
    %255 = arith.mulf %254, %253 : vector<16x128xf32>
    %256 = arith.mulf %243, %255 : vector<16x128xf32>
    %c0_133 = arith.constant 0 : index
    %c0_134 = arith.constant 0 : index
    %257 = vector.load %arg21[%c0_133, %c0_134] : memref<128x32xf32, #tpu.memory_space<vmem>>, vector<128x32xf32>
    %cst_135 = arith.constant dense<0.000000e+00> : vector<16x32xf32>
    %258 = tpu.matmul %256, %257, %cst_135 {dimension_numbers = #tpu.dot_dimension_numbers<[1], [0], [0], [1], [0, 0, 1, 1], [], []>} : vector<16x128xf32>, vector<128x32xf32>, vector<16x32xf32> -> vector<16x32xf32>
    %c0_136 = arith.constant 0 : index
    %c0_137 = arith.constant 0 : index
    %259 = vector.load %arg22[%c0_136, %c0_137] : memref<1x32xf32, #tpu.memory_space<vmem>>, vector<1x32xf32>
    %260 = vector.broadcast %259 : vector<1x32xf32> to vector<16x32xf32>
    %261 = arith.addf %258, %260 : vector<16x32xf32>
    %262 = arith.mulf %56, %261 : vector<16x32xf32>
    %c0_138 = arith.constant 0 : index
    %c0_139 = arith.constant 0 : index
    %263 = vector.load %arg23[%c0_138, %c0_139] : memref<1x32xf32, #tpu.memory_space<vmem>>, vector<1x32xf32>
    %264 = arith.subf %262, %234 : vector<16x32xf32>
    %265 = vector.broadcast %263 : vector<1x32xf32> to vector<16x32xf32>
    %266 = arith.mulf %265, %264 : vector<16x32xf32>
    %267 = arith.addf %234, %266 : vector<16x32xf32>
    %268 = arith.mulf %267, %267 : vector<16x32xf32>
    %cst_140 = arith.constant dense<0.000000e+00> : vector<16xf32>
    %269 = vector.multi_reduction <add>, %268, %cst_140 [1] : vector<16x32xf32> to vector<16xf32>
    %270 = vector.shape_cast %269 : vector<16xf32> to vector<16x1xf32>
    %cst_141 = arith.constant 1.000000e-24 : f32
    %271 = vector.broadcast %cst_141 : f32 to vector<16x1xf32>
    %272 = arith.maximumf %270, %271 : vector<16x1xf32>
    %273 = math.rsqrt %272 : vector<16x1xf32>
    %274 = vector.broadcast %273 : vector<16x1xf32> to vector<16x32xf32>
    %275 = arith.mulf %267, %274 : vector<16x32xf32>
    %c0_142 = arith.constant 0 : index
    %c0_143 = arith.constant 0 : index
    %276 = vector.load %arg24[%c0_142, %c0_143] : memref<16x32xf32, #tpu.memory_space<vmem>>, vector<16x32xf32>
    tpu.vector_store %arg24[%c0_142, %c0_143], %275 {strides = array<i32>} : memref<16x32xf32, #tpu.memory_space<vmem>>, vector<16x32xf32>,
    return
  }
}

</mosaic_0001>

<bundles_post_ra>
// kernel: dit_block_forward.1
= control target key start
LH: loop header
LB: loop body
LE: loop exit
PB: predicated region body
PF: predicated region fallthrough
CT: control target
= control target key end

     0   :  { %s4232_s0 = inlined_call_operand.vmem [shape: f32[16,32], index: 0, kind: input, shape index: {}]   ;;  %s4233_s1 = inlined_call_operand.hbm [shape: f32[2,32], index: 1, kind: input, shape index: {}]   ;;  %s4234_s2 = inlined_call_operand.hbm [shape: f32[6,32,32], index: 2, kind: input, shape index: {}]   ;;  %s4235_s3 = inlined_call_operand.vmem [shape: f32[6,1,32], index: 3, kind: input, shape index: {}]   ;;  %s4236_s4 = inlined_call_operand.vmem [shape: f32[16,2], index: 4, kind: input, shape index: {}]   ;;  %s4237_s5 = inlined_call_operand.vmem [shape: f32[32,32], index: 5, kind: input, shape index: {}]   ;;  %s4238_s6 = inlined_call_operand.vmem [shape: f32[32,32], index: 6, kind: input, shape index: {}]   ;;  %s4239_s7 = inlined_call_operand.vmem [shape: f32[32,32], index: 7, kind: input, shape index: {}]   ;;  %s4240_s8 = inlined_call_operand.hbm [shape: f32[1,32], index: 8, kind: input, shape index: {}]   ;;  %s4241_s9 = inlined_call_operand.hbm [shape: f32[16,32], index: 9, kind: input, shape index: {}]   ;;  %s4242_s10 = inlined_call_operand.hbm [shape: f32[16,32], index: 10, kind: input, shape index: {}]   ;;  %s4243_s11 = inlined_call_operand.vmem [shape: f32[32,32], index: 11, kind: input, shape index: {}]   ;;  %s4244_s12 = inlined_call_operand.vmem [shape: f32[32,32], index: 12, kind: input, shape index: {}]   ;;  %s4245_s13 = inlined_call_operand.vmem [shape: f32[4,1,32], index: 13, kind: input, shape index: {}]   ;;  %s4246_s14 = inlined_call_operand.hbm [shape: f32[16,16], index: 14, kind: input, shape index: {}]   ;;  %s4247_s15 = inlined_call_operand.hbm [shape: f32[16,16], index: 15, kind: input, shape index: {}]   ;;  %s4248_s16 = inlined_call_operand.hbm [shape: f32[32,32], index: 16, kind: input, shape index: {}]   ;;  %s4249_s17 = inlined_call_operand.hbm [shape: f32[1,32], index: 17, kind: input, shape index: {}]   ;;  %s4250_s18 = inlined_call_operand.hbm [shape: f32[1,32], index: 18, kind: input, shape index: {}]   ;;  %s4251_s19 = inlined_call_operand.hbm [shape: f32[32,128], index: 19, kind: input, shape index: {}]   ;;  %s4252_s20 = inlined_call_operand.hbm [shape: f32[1,128], index: 20, kind: input, shape index: {}]   ;;  %s4253_s21 = inlined_call_operand.vmem [shape: f32[128,32], index: 21, kind: input, shape index: {}]   ;;  %s4254_s22 = inlined_call_operand.hbm [shape: f32[1,32], index: 22, kind: input, shape index: {}]   ;;  %s4255_s23 = inlined_call_operand.vmem [shape: f32[1,32], index: 23, kind: input, shape index: {}]   ;;  %s4256_s24 = inlined_call_operand.hbm [shape: f32[16,32], index: 24, kind: output, shape index: {}]  }
   0x1   :  { %4263 = sst [smem:[#allocation32_spill]] %s4232_s0 }
   0x2   :  { %4264 = sst [smem:[#allocation33_spill]] %s4233_s1 }
   0x3   :  { %4265 = sst [smem:[#allocation34_spill]] %s4234_s2 }
   0x4   :  { %4266 = sst [smem:[#allocation35_spill]] %s4235_s3 }
   0x5   :  { %4267 = sst [smem:[#allocation36_spill]] %s4236_s4 }
   0x6   :  { %4268 = sst [smem:[#allocation37_spill]] %s4237_s5 }
   0x7   :  { %4269 = sst [smem:[#allocation38_spill]] %s4238_s6 }
   0x8   :  { %4270 = sst [smem:[#allocation39_spill]] %s4239_s7 }
   0x9   :  { %4271 = sst [smem:[#allocation40_spill]] %s4240_s8 }
   0xa   :  { %29 = vsyncpa [#allocation3], 0 }
   0xb   :  { %30 = vsyncpa [#allocation6], 0 }
   0xc   :  { %31 = vsyncpa [#allocation9], 0 }
   0xd   :  { %32 = vsyncpa [#allocation12], 0 }
   0xe   :  { %33 = vsyncpa [#allocation15], 0 }
   0xf   :  { %34 = vsyncpa [#allocation18], 0 }
  0x10   :  { %35 = vsyncpa [#allocation21], 0 }
  0x11   :  { %36 = vsyncpa [#allocation4], 0  ;;  %s3641_s5 = smov [#allocation5]  }
  0x12   :  { %s54_s26 = sshll.u32 %s3641_s5, 4  ;;  %s55_s26 = int_to_ptr.vmem [resolvable:$true] %s54_s26 }
  0x13   :  { %s3353_s27 = scalar_lea.vmem %s55_s26, 3072  ;;  %p3358_p1 = scmp.lt.s32.totalorder %s55_s26, %s55_s26 }
  0x14   :  { %p3354_p0 = scmp.ne.s32.totalorder %s55_s26, %s3353_s27  ;;  %p3359_p2 = scmp.lt.s32.totalorder %s3353_s27, %s3353_s27 }
  0x16   :  { %p3360_p3 = por %p3359_p2, %p3358_p1 }
  0x18   :  { %p3361_p4 = pnand %p3360_p3, %p3354_p0 }
  0x1a   :  { %3364 = shalt.err (!%p3361_p4)
}
  0x1b   :  { %s3642_s28 = smov 128   ;;  %s3643_s6 = smov 8  }
  0x1c   :  { %s4272_s0 = sld [smem:[#allocation34_spill]]  ;;  %s3644_s7 = smov [#allocation8]  }
  0x1d   :  { %s86_s30 = sshll.u32 %s3644_s7, 4  ;;  %s3645_s3 = smov [#allocation11]   ;;  %s87_s30 = int_to_ptr.vmem [resolvable:$true] %s86_s30 }
  0x1e   :  { %s116_s25 = sshll.u32 %s3645_s3, 4  ;;  %s3373_s8 = scalar_lea.vmem %s87_s30, 256  ;;  %s117_s25 = int_to_ptr.vmem [resolvable:$true] %s116_s25 }
  0x1f   :  { %p3374_p5 = scmp.ne.s32.totalorder %s87_s30, %s3373_s8  ;;  %p3378_p6 = scmp.lt.s32.totalorder %s87_s30, %s87_s30 }
  0x20   :  { %p3379_p7 = scmp.lt.s32.totalorder %s3373_s8, %s3373_s8 }
  0x22   :  { %60 = dma.hbm_to_vmem [thread:$0]  %s4272_s0, 3072, %s55_s26, [#allocation6], %s3642_s28, %s3642_s28, %s3643_s6  }
  0x23   :  { %p3380_p8 = por %p3379_p7, %p3378_p6 }
  0x25   :  { %p3381_p9 = pnand %p3380_p8, %p3374_p5 }
  0x27   :  { %3384 = shalt.err (!%p3381_p9)
}
  0x28   :  { %92 = dma.hbm_to_vmem [thread:$0]  %s4241_s9, 256, %s87_s30, [#allocation9], %s3642_s28, %s3642_s28, %s3643_s6  }
  0x29   :  { %s3393_s5 = scalar_lea.vmem %s117_s25, 256  ;;  %p3398_p11 = scmp.lt.s32.totalorder %s117_s25, %s117_s25 }
  0x2a   :  { %p3394_p10 = scmp.ne.s32.totalorder %s117_s25, %s3393_s5  ;;  %p3399_p12 = scmp.lt.s32.totalorder %s3393_s5, %s3393_s5 }
  0x2c   :  { %p3400_p13 = por %p3399_p12, %p3398_p11 }
  0x2e   :  { %p3401_p0 = pnand %p3400_p13, %p3394_p10 }
  0x30   :  { %3404 = shalt.err (!%p3401_p0)
}
  0x31   :  { %122 = dma.hbm_to_vmem [thread:$0]  %s4246_s14, 256, %s117_s25, [#allocation12], %s3642_s28, %s3642_s28, %s3643_s6  }
  0x32   :  { %s3646_s2 = smov [#allocation14]   ;;  %s3647_s0 = smov [#allocation17]  }
  0x33   :  { %s140_s29 = sshll.u32 %s3646_s2, 4  ;;  %s163_s9 = sshll.u32 %s3647_s0, 4  ;;  %s141_s29 = int_to_ptr.vmem [resolvable:$true] %s140_s29  ;;  %s164_s9 = int_to_ptr.vmem [resolvable:$true] %s163_s9 }
  0x34   :  { %s3413_s7 = scalar_lea.vmem %s141_s29, 512  ;;  %p3418_p2 = scmp.lt.s32.totalorder %s141_s29, %s141_s29 }
  0x35   :  { %p3414_p1 = scmp.ne.s32.totalorder %s141_s29, %s3413_s7  ;;  %p3419_p3 = scmp.lt.s32.totalorder %s3413_s7, %s3413_s7 }
  0x37   :  { %p3420_p4 = por %p3419_p3, %p3418_p2 }
  0x39   :  { %p3421_p5 = pnand %p3420_p4, %p3414_p1 }
  0x3b   :  { %3424 = shalt.err (!%p3421_p5)
}
  0x3c   :  { %146 = dma.hbm_to_vmem [thread:$0]  %s4248_s16, 512, %s141_s29, [#allocation15], %s3642_s28, %s3642_s28, %s3643_s6  }
  0x3d   :  { %s3433_s14 = scalar_lea.vmem %s164_s9, 16  ;;  %s3437_s25 = scalar_lea.vmem %s164_s9, 32 }
  0x3e   :  { %p3434_p6 = scmp.ne.s32.totalorder %s164_s9, %s3433_s14  ;;  %p3438_p7 = scmp.lt.s32.totalorder %s164_s9, %s164_s9 }
  0x3f   :  { %p3439_p8 = scmp.lt.s32.totalorder %s3437_s25, %s3433_s14 }
  0x41   :  { %p3440_p9 = por %p3439_p8, %p3438_p7 }
  0x43   :  { %p3441_p10 = pnand %p3440_p9, %p3434_p6 }
  0x45   :  { %3444 = shalt.err (!%p3441_p10)
}
  0x46   :  { %166 = dma.hbm_to_vmem [thread:$0]  %s4250_s18, 16, %s164_s9, [#allocation18]  }
  0x47   :  { %s3648_s1 = smov [#allocation20]   ;;  %s3649_s26 = smov [#allocation2]  }
  0x48   :  { %s185_s5 = sshll.u32 %s3648_s1, 4  ;;  %s45_s27 = sshll.u32 %s3649_s26, 4  ;;  %s186_s5 = int_to_ptr.vmem [resolvable:$true] %s185_s5  ;;  %s46_s27 = int_to_ptr.vmem [resolvable:$true] %s45_s27 }
  0x49   :  { %s3453_s2 = scalar_lea.vmem %s186_s5, 16  ;;  %s3457_s16 = scalar_lea.vmem %s186_s5, 32 }
  0x4a   :  { %p3454_p11 = scmp.ne.s32.totalorder %s186_s5, %s3453_s2  ;;  %p3458_p12 = scmp.lt.s32.totalorder %s186_s5, %s186_s5 }
  0x4b   :  { %p3459_p13 = scmp.lt.s32.totalorder %s3457_s16, %s3453_s2 }
  0x4d   :  { %p3460_p0 = por %p3459_p13, %p3458_p12 }
  0x4f   :  { %p3461_p1 = pnand %p3460_p0, %p3454_p11 }
  0x51   :  { %3464 = shalt.err (!%p3461_p1)
}
  0x52   :  { %188 = dma.hbm_to_vmem [thread:$0]  %s4252_s20, 16, %s186_s5, [#allocation21]  }
  0x53   :  { %s3473_s7 = scalar_lea.vmem %s46_s27, 32  ;;  %p3478_p3 = scmp.lt.s32.totalorder %s46_s27, %s46_s27 }
  0x54   :  { %p3474_p2 = scmp.ne.s32.totalorder %s46_s27, %s3473_s7  ;;  %p3479_p4 = scmp.lt.s32.totalorder %s3473_s7, %s3473_s7 }
  0x56   :  { %p3480_p5 = por %p3479_p4, %p3478_p3 }
  0x58   :  { %p3481_p6 = pnand %p3480_p5, %p3474_p2 }
  0x5a   :  { %3484 = shalt.err (!%p3481_p6)
}
  0x5b   :  { %s4273_s30 = sld [smem:[#allocation33_spill]]  ;;  %s3650_s3 = smov [#allocation7]  }
  0x5c   :  { %s77_s14 = sshll.u32 %s3650_s3, 4  ;;  %s3651_s25 = smov [#allocation10]   ;;  %s78_s14 = int_to_ptr.vmem [resolvable:$true] %s77_s14 }
  0x5d   :  { %s98_s8 = sshll.u32 %s3651_s25, 4  ;;  %s3493_s4 = scalar_lea.vmem %s78_s14, 16  ;;  %s99_s8 = int_to_ptr.vmem [resolvable:$true] %s98_s8 }
  0x5e   :  { %p3494_p7 = scmp.ne.s32.totalorder %s78_s14, %s3493_s4  ;;  %s3497_s20 = scalar_lea.vmem %s78_s14, 32 }
  0x5f   :  { %p3498_p8 = scmp.lt.s32.totalorder %s78_s14, %s78_s14  ;;  %p3499_p9 = scmp.lt.s32.totalorder %s3497_s20, %s3493_s4 }
  0x61   :  { %48 = dma.hbm_to_vmem [thread:$0]  %s4273_s30, 32, %s46_s27, [#allocation3]  }
  0x62   :  { %p3500_p10 = por %p3499_p9, %p3498_p8 }
  0x64   :  { %p3501_p11 = pnand %p3500_p10, %p3494_p7 }
  0x66   :  { %3504 = shalt.err (!%p3501_p11)
}
  0x67   :  { %s4274_s26 = sld [smem:[#allocation40_spill]]  ;;  %s3513_s2 = scalar_lea.vmem %s99_s8, 256 }
  0x68   :  { %p3514_p12 = scmp.ne.s32.totalorder %s99_s8, %s3513_s2  ;;  %p3518_p13 = scmp.lt.s32.totalorder %s99_s8, %s99_s8 }
  0x69   :  { %p3519_p0 = scmp.lt.s32.totalorder %s3513_s2, %s3513_s2 }
  0x6b   :  { %p3520_p1 = por %p3519_p0, %p3518_p13 }
  0x6d   :  { %80 = dma.hbm_to_vmem [thread:$0]  %s4274_s26, 16, %s78_s14, [#allocation6]  }
  0x6e   :  { %p3521_p2 = pnand %p3520_p1, %p3514_p12 }
  0x70   :  { %3524 = shalt.err (!%p3521_p2)
}
  0x71   :  { %104 = dma.hbm_to_vmem [thread:$0]  %s4242_s10, 256, %s99_s8, [#allocation9], %s3642_s28, %s3642_s28, %s3643_s6  }
  0x72   :  { %s3652_s29 = smov [#allocation13]   ;;  %s3653_s7 = smov [#allocation16]  }
  0x73   :  { %s128_s0 = sshll.u32 %s3652_s29, 4  ;;  %s153_s18 = sshll.u32 %s3653_s7, 4  ;;  %s129_s0 = int_to_ptr.vmem [resolvable:$true] %s128_s0  ;;  %s154_s18 = int_to_ptr.vmem [resolvable:$true] %s153_s18 }
  0x74   :  { %s3533_s9 = scalar_lea.vmem %s129_s0, 256  ;;  %p3538_p4 = scmp.lt.s32.totalorder %s129_s0, %s129_s0 }
  0x75   :  { %p3534_p3 = scmp.ne.s32.totalorder %s129_s0, %s3533_s9  ;;  %p3539_p5 = scmp.lt.s32.totalorder %s3533_s9, %s3533_s9 }
  0x77   :  { %p3540_p6 = por %p3539_p5, %p3538_p4 }
  0x79   :  { %p3541_p7 = pnand %p3540_p6, %p3534_p3 }
  0x7b   :  { %3544 = shalt.err (!%p3541_p7)
}
  0x7c   :  { %134 = dma.hbm_to_vmem [thread:$0]  %s4247_s15, 256, %s129_s0, [#allocation12], %s3642_s28, %s3642_s28, %s3643_s6  }
  0x7d   :  { %s3553_s10 = scalar_lea.vmem %s154_s18, 16  ;;  %s3557_s14 = scalar_lea.vmem %s154_s18, 32 }
  0x7e   :  { %p3554_p8 = scmp.ne.s32.totalorder %s154_s18, %s3553_s10  ;;  %p3558_p9 = scmp.lt.s32.totalorder %s154_s18, %s154_s18 }
  0x7f   :  { %p3559_p10 = scmp.lt.s32.totalorder %s3557_s14, %s3553_s10 }
  0x81   :  { %p3560_p11 = por %p3559_p10, %p3558_p9 }
  0x83   :  { %p3561_p12 = pnand %p3560_p11, %p3554_p8 }
  0x85   :  { %3564 = shalt.err (!%p3561_p12)
}
  0x86   :  { %156 = dma.hbm_to_vmem [thread:$0]  %s4249_s17, 16, %s154_s18, [#allocation15]  }
  0x87   :  { %s3654_s4 = smov [#allocation19]   ;;  %s3655_s1 = smov [#allocation22]  }
  0x88   :  { %s172_s20 = sshll.u32 %s3654_s4, 4  ;;  %s197_s5 = sshll.u32 %s3655_s1, 4  ;;  %s173_s20 = int_to_ptr.vmem [resolvable:$true] %s172_s20  ;;  %s198_s5 = int_to_ptr.vmem [resolvable:$true] %s197_s5 }
  0x89   :  { %s3573_s26 = scalar_lea.vmem %s173_s20, 512  ;;  %p3578_p0 = scmp.lt.s32.totalorder %s173_s20, %s173_s20 }
  0x8a   :  { %p3574_p13 = scmp.ne.s32.totalorder %s173_s20, %s3573_s26  ;;  %p3579_p1 = scmp.lt.s32.totalorder %s3573_s26, %s3573_s26 }
  0x8c   :  { %p3580_p2 = por %p3579_p1, %p3578_p0 }
  0x8e   :  { %p3581_p3 = pnand %p3580_p2, %p3574_p13 }
  0x90   :  { %3584 = shalt.err (!%p3581_p3)
}
  0x91   :  { %178 = dma.hbm_to_vmem [thread:$0]  %s4251_s19, 512, %s173_s20, [#allocation18], %s3642_s28, %s3642_s28, %s3643_s6  }
  0x92   :  { %s3593_s17 = scalar_lea.vmem %s198_s5, 16  ;;  %s3597_s27 = scalar_lea.vmem %s198_s5, 32 }
  0x93   :  { %p3594_p4 = scmp.ne.s32.totalorder %s198_s5, %s3593_s17  ;;  %p3598_p5 = scmp.lt.s32.totalorder %s198_s5, %s198_s5 }
  0x94   :  { %p3599_p6 = scmp.lt.s32.totalorder %s3597_s27, %s3593_s17 }
  0x96   :  { %p3600_p7 = por %p3599_p6, %p3598_p5 }
  0x98   :  { %p3601_p8 = pnand %p3600_p7, %p3594_p4 }
  0x9a   :  { %3604 = shalt.err (!%p3601_p8)
}
  0x9b   :  { %200 = dma.hbm_to_vmem [thread:$0]  %s4254_s22, 16, %s198_s5, [#allocation21]  }
  0x9c   :  { %3625 = dma.done.wait [#allocation3], 32  }
  0x9d   :  { %3626 = vsyncadd [#allocation3], 4294967264 }
  0x9e   :  { %3627 = dma.done.wait [#allocation6], 3088  }
  0x9f   :  { %3628 = vsyncadd [#allocation6], 4294964208 }
  0xa0   :  { %3629 = dma.done.wait [#allocation9], 512  }
  0xa1   :  { %3630 = vsyncadd [#allocation9], 4294966784 }
  0xa2   :  { %3631 = dma.done.wait [#allocation12], 512  }
  0xa3   :  { %3632 = vsyncadd [#allocation12], 4294966784 }
  0xa4   :  { %3633 = dma.done.wait [#allocation15], 528  }
  0xa5   :  { %3634 = vsyncadd [#allocation15], 4294966768 }
  0xa6   :  { %3635 = dma.done.wait [#allocation18], 528  }
  0xa7   :  { %3636 = vsyncadd [#allocation18], 4294966768 }
  0xa8   :  { %3637 = dma.done.wait [#allocation21], 32  }
  0xa9   :  { %3638 = vsyncadd [#allocation21], 4294967264  ;;  %vm262_vm0 = vcmask 15360   ;;  %v244_v0 = vld [vmem:[#allocation2] sm:$0x3]  ;;  %s4275_s7 = sld [smem:[#allocation36_spill]] }
  0xaa   :  { %v255_v2 = vsub.f32 0.0, %v244_v0  ;;  %v709_v3 = vld [vmem:[#allocation5 + $0x98] sm:$0xff]  ;;  %v708_v4 = vld [vmem:[#allocation5 + $0x90] sm:$0xff]  ;;  %vm269_vm1 = vcmask 1041408   ;;  %v349_v13 = vld [vmem:[#allocation5 + $0x8] sm:$0xff]  ;;  %vm359_vm2 = vcmask 261120  }
  0xab   :  { %3057 = vmatprep.subr.mxu1 %v709_v3  ;;  %v351_v11 = vld [vmem:[#allocation5 + $0x18] sm:$0xff]  ;;  %v350_v12 = vld [vmem:[#allocation5 + $0x10] sm:$0xff]  ;;  %v707_v14 = vld [vmem:[#allocation5 + $0x88] sm:$0xff]  ;;  %s4276_s3 = sld [smem:[#allocation37_spill]]  ;;  %vm1605_vm3 = vcmask 130048  }
  0xac   :  { %v256_v5 = vmul.f32 1.442695, %v255_v2  ;;  %3058 = vmatpush3.msra.mxu1 %v709_v3  ;;  %v348_v15 = vld [vmem:[#allocation5] sm:$0xff]  ;;  %v445_v17 = vld [vmem:[#allocation5 + $0x38] sm:$0xff]  ;;  %v444_v20 = vld [vmem:[#allocation5 + $0x30] sm:$0xff]  ;;  %s4277_s25 = sld [smem:[#allocation38_spill]] }
  0xad   :  { %3059 = vmatprep.subr.mxu1 %v708_v4  ;;  %v706_v16 = vld [vmem:[#allocation5 + $0x80] sm:$0xff]  ;;  %v443_v21 = vld [vmem:[#allocation5 + $0x28] sm:$0xff]  ;;  %v533_v23 = vld [vmem:[#allocation5 + $0x58] sm:$0xff] }
  0xae   :  { %3285 = vpow2.f32 %v256_v5  ;;  %3060 = vmatpush3.msra.mxu1 %v708_v4  ;;  %v442_v22 = vld [vmem:[#allocation5 + $0x20] sm:$0xff]  ;;  %v532_v24 = vld [vmem:[#allocation5 + $0x50] sm:$0xff]  ;;  %v531_v25 = vld [vmem:[#allocation5 + $0x48] sm:$0xff] }
  0xaf   :  { %v245_v1 = vld [vmem:[%s4275_s7] sm:$0xff]  ;;  %v246_v10 = vld [vmem:[%s4275_s7 + $0x8] sm:$0xff]  ;;  %3061 = vmatprep.subr.mxu1 %v707_v14  ;;  %v620_v28 = vld [vmem:[#allocation5 + $0x70] sm:$0xff]  ;;  %s4278_s7 = sld [smem:[#allocation39_spill]] }
  0xb0   :  { %3010 = vmatprep.mubr.msk.f32.mxu0 %vm262_vm0, %v245_v1  ;;  %3062 = vmatpush3.msra.mxu1 %v707_v14  ;;  %v530_v26 = vld [vmem:[#allocation5 + $0x40] sm:$0xff]  ;;  %v621_v27 = vld [vmem:[#allocation5 + $0x78] sm:$0xff]  ;;  %v619_v29 = vld [vmem:[#allocation5 + $0x68] sm:$0xff] }
  0xb1   :  { %3063 = vmatprep.subr.mxu1 %v706_v16  ;;  %v618_v30 = vld [vmem:[#allocation5 + $0x60] sm:$0xff]  ;;  %v797_v31 = vld [vmem:[#allocation5 + $0xb8] sm:$0xff]  ;;  %v796_v32 = vld [vmem:[#allocation5 + $0xb0] sm:$0xff] }
  0xb2   :  { %3064 = vmatpush3.msra.mxu1 %v706_v16  ;;  %v795_v33 = vld [vmem:[#allocation5 + $0xa8] sm:$0xff]  ;;  %v794_v34 = vld [vmem:[#allocation5 + $0xa0] sm:$0xff]  ;;  %v890_v35 = vld [vmem:[%s4276_s3 + $0x18] sm:$0xff] }
  0xb3   :  { %3079 = vmatprep.subr.mxu1 %v890_v35  ;;  %v975_v36 = vld [vmem:[%s4277_s25 + $0x18] sm:$0xff]  ;;  %v889_v37 = vld [vmem:[%s4276_s3 + $0x10] sm:$0xff]  ;;  %v888_v39 = vld [vmem:[%s4276_s3 + $0x8] sm:$0xff] }
  0xb4   :  { %v974_v38 = vld [vmem:[%s4277_s25 + $0x10] sm:$0xff]  ;;  %v973_v40 = vld [vmem:[%s4277_s25 + $0x8] sm:$0xff]  ;;  %v887_v41 = vld [vmem:[%s4276_s3] sm:$0xff]  ;;  %s4279_s3 = sld [smem:[#allocation35_spill]] }
  0xb5   :  { %v972_v42 = vld [vmem:[%s4277_s25] sm:$0xff]  ;;  %v1054_v43 = vld [vmem:[%s4278_s7 + $0x18] sm:$0xff]  ;;  %s4280_s25 = sld [smem:[#allocation32_spill]]  ;;  %v1053_v63 = vld [vmem:[%s4278_s7 + $0x10] sm:$0xff] }
  0xb6   :  { %v250_v44 = vld [vmem:[%s4244_s12 + $0x18] sm:$0xff]  ;;  %v1051_v1 = vld [vmem:[%s4278_s7] sm:$0xff]  ;;  %v249_v2 = vld [vmem:[%s4244_s12 + $0x10] sm:$0xff] }
  0xb7   :  { %v248_v3 = vld [vmem:[%s4244_s12 + $0x8] sm:$0xff]  ;;  %v247_v4 = vld [vmem:[%s4244_s12] sm:$0xff] }
  0xba   :  { %v2791_v47 = vld [vmem:[%s4279_s3 + $0x1] ss:$0 sm:$0xff]  ;;  %v2787_v55 = vld [vmem:[%s4279_s3] ss:$0 sm:$0xff] }
  0xbb   :  { %v3286_v6 = vpop.eup %3285  ;;  %v3898_v51 = vld [vmem:[%s4280_s25 + $0x8] sm:$0xff]  ;;  %v3903_v54 = vld [vmem:[%s4280_s25] sm:$0xff] }
  0xbc   :  { %v258_v7 = vadd.f32 1.0, %v3286_v6 }
  0xbe   :  { %3287 = vrcp.f32 %v258_v7 }
  0xcb   :  { %v3288_v8 = vpop.eup %3287 }
  0xcc   :  { %v261_v9 = vmul.f32 %v3288_v8, %v244_v0  ;;  %v1052_v0 = vld [vmem:[%s4278_s7 + $0x8] sm:$0xff] }
  0xce   :  { %3008 = vmatprep.subr.msk.mxu0 %vm269_vm1, %v261_v9 }
  0xcf   :  { %3009 = vmatpush3.msk.msra.mxu0 %vm269_vm1, %v261_v9 }
  0xd0   :  { %3011 = vmatmul.mubr.msk.f32.vlgmr.msra.gmra.mxu0 %vm262_vm0, %v246_v10  ;;  %3013 = vmatprep.subr.mxu0 %v351_v11 }
  0xd1   :  { %3014 = vmatpush3.msra.mxu0 %v351_v11 }
  0xd2   :  { %3015 = vmatprep.subr.mxu0 %v350_v12 }
  0xd3   :  { %3016 = vmatpush3.msra.mxu0 %v350_v12 }
  0xd4   :  { %3017 = vmatprep.subr.mxu0 %v349_v13 }
  0xd5   :  { %3018 = vmatpush3.msra.mxu0 %v349_v13 }
  0xd6   :  { %3019 = vmatprep.subr.mxu0 %v348_v15 }
  0xd7   :  { %3020 = vmatpush3.msra.mxu0 %v348_v15 }
  0xd8   :  { %3024 = vmatprep.subr.mxu0 %v445_v17 }
 0x190   :  { %v3012_v18 = vpop.f32.mrf.mxu0 }
 0x192   :  { %v339_v19 = vpop.f32.mrf.mxu0 }
 0x193   :  { %3021 = vmatprep.mubr.msk.f32.mxu0 %vm359_vm2, %v339_v19  ;;  %3065 = vmatprep.mubr.msk.f32.mxu1 %vm359_vm2, %v339_v19 }
 0x194   :  { %3022 = vmatmul.mubr.msk.f32.vlgmr.msra.gmra.mxu0 %vm359_vm2, %v3012_v18  ;;  %3066 = vmatmul.mubr.msk.f32.vlgmr.msra.gmra.mxu1 %vm359_vm2, %v3012_v18 }
 0x195   :  { %3025 = vmatpush3.msra.mxu0 %v445_v17  ;;  %3032 = vmatprep.mubr.msk.f32.mxu0 %vm359_vm2, %v339_v19 }
 0x196   :  { %3026 = vmatprep.subr.mxu0 %v444_v20  ;;  %3080 = vmatpush3.msra.mxu1 %v890_v35 }
 0x197   :  { %3027 = vmatpush3.msra.mxu0 %v444_v20  ;;  %3081 = vmatprep.subr.mxu1 %v889_v37 }
 0x198   :  { %3028 = vmatprep.subr.mxu0 %v443_v21  ;;  %3082 = vmatpush3.msra.mxu1 %v889_v37 }
 0x199   :  { %3029 = vmatpush3.msra.mxu0 %v443_v21  ;;  %3083 = vmatprep.subr.mxu1 %v888_v39  ;;  %v1326_v21 = vld [vmem:[%s4243_s11 + $0x18] sm:$0xff] }
 0x19a   :  { %3030 = vmatprep.subr.mxu0 %v442_v22  ;;  %3084 = vmatpush3.msra.mxu1 %v888_v39 }
 0x19b   :  { %3031 = vmatpush3.msra.mxu0 %v442_v22  ;;  %3085 = vmatprep.subr.mxu1 %v887_v41  ;;  %v1325_v22 = vld [vmem:[%s4243_s11 + $0x10] sm:$0xff] }
 0x19c   :  { %3033 = vmatmul.mubr.msk.f32.vlgmr.msra.gmra.mxu0 %vm359_vm2, %v3012_v18  ;;  %3035 = vmatprep.subr.mxu0 %v533_v23 }
 0x19d   :  { %3036 = vmatpush3.msra.mxu0 %v533_v23  ;;  %3043 = vmatprep.mubr.msk.f32.mxu0 %vm359_vm2, %v339_v19  ;;  %v1324_v23 = vld [vmem:[%s4243_s11 + $0x8] sm:$0xff] }
 0x19e   :  { %3037 = vmatprep.subr.mxu0 %v532_v24  ;;  %3086 = vmatpush3.msra.mxu1 %v887_v41 }
 0x19f   :  { %3038 = vmatpush3.msra.mxu0 %v532_v24  ;;  %3101 = vmatprep.subr.mxu1 %v1054_v43  ;;  %v1323_v24 = vld [vmem:[%s4243_s11] sm:$0xff] }
 0x1a0   :  { %3039 = vmatprep.subr.mxu0 %v531_v25 }
 0x1a1   :  { %3040 = vmatpush3.msra.mxu0 %v531_v25 }
 0x1a2   :  { %3041 = vmatprep.subr.mxu0 %v530_v26 }
 0x1a3   :  { %3042 = vmatpush3.msra.mxu0 %v530_v26 }
 0x1a4   :  { %3044 = vmatmul.mubr.msk.f32.vlgmr.msra.gmra.mxu0 %vm359_vm2, %v3012_v18  ;;  %3046 = vmatprep.subr.mxu0 %v621_v27 }
 0x1a5   :  { %3047 = vmatpush3.msra.mxu0 %v621_v27  ;;  %3054 = vmatprep.mubr.msk.f32.mxu0 %vm359_vm2, %v339_v19 }
 0x1a6   :  { %3048 = vmatprep.subr.mxu0 %v620_v28 }
 0x1a7   :  { %3049 = vmatpush3.msra.mxu0 %v620_v28 }
 0x1a8   :  { %3050 = vmatprep.subr.mxu0 %v619_v29 }
 0x1a9   :  { %3051 = vmatpush3.msra.mxu0 %v619_v29 }
 0x1aa   :  { %3052 = vmatprep.subr.mxu0 %v618_v30 }
 0x1ab   :  { %3053 = vmatpush3.msra.mxu0 %v618_v30 }
 0x1ac   :  { %3055 = vmatmul.mubr.msk.f32.vlgmr.msra.gmra.mxu0 %vm359_vm2, %v3012_v18  ;;  %3068 = vmatprep.subr.mxu0 %v797_v31 }
 0x1ad   :  { %3069 = vmatpush3.msra.mxu0 %v797_v31  ;;  %3076 = vmatprep.mubr.msk.f32.mxu0 %vm359_vm2, %v339_v19 }
 0x1ae   :  { %3070 = vmatprep.subr.mxu0 %v796_v32 }
 0x1af   :  { %3071 = vmatpush3.msra.mxu0 %v796_v32 }
 0x1b0   :  { %3072 = vmatprep.subr.mxu0 %v795_v33 }
 0x1b1   :  { %3073 = vmatpush3.msra.mxu0 %v795_v33 }
 0x1b2   :  { %3074 = vmatprep.subr.mxu0 %v794_v34 }
 0x1b3   :  { %3075 = vmatpush3.msra.mxu0 %v794_v34 }
 0x1b4   :  { %3077 = vmatmul.mubr.msk.f32.vlgmr.msra.gmra.mxu0 %vm359_vm2, %v3012_v18  ;;  %3090 = vmatprep.subr.mxu0 %v975_v36 }
 0x1b5   :  { %3091 = vmatpush3.msra.mxu0 %v975_v36 }
 0x1b6   :  { %3092 = vmatprep.subr.mxu0 %v974_v38 }
 0x1b7   :  { %3093 = vmatpush3.msra.mxu0 %v974_v38 }
 0x1b8   :  { %3094 = vmatprep.subr.mxu0 %v973_v40 }
 0x1b9   :  { %3095 = vmatpush3.msra.mxu0 %v973_v40  ;;  %v2818_v40 = vld [vmem:[#allocation7] ss:$0 sm:$0xff] }
 0x1ba   :  { %3096 = vmatprep.subr.mxu0 %v972_v42 }
 0x1bb   :  { %3097 = vmatpush3.msra.mxu0 %v972_v42 }
 0x1bc   :  { %3112 = vmatprep.subr.mxu0 %v250_v44 }
 0x254   :  { %v3023_v45 = vpop.f32.mrf.mxu0  ;;  %v3942_v9 = vpop.f32.mrf.mxu1 }
 0x255   :  { %v438_v60 = vadd.f32 %v3023_v45, %v2787_v55 }
 0x256   :  { %v432_v46 = vpop.f32.mrf.mxu0  ;;  %v3946_v11 = vpop.f32.mrf.mxu1 }
 0x257   :  { %v433_v58 = vadd.f32 %v2787_v55, %v432_v46  ;;  %v1319_v55 = vld [vmem:[#allocation8] sm:$0xff] }
 0x25c   :  { %v3034_v48 = vpop.f32.mrf.mxu0 }
 0x25d   :  { %v526_v49 = vadd.f32 %v3034_v48, %v2791_v47  ;;  %v1320_v48 = vld [vmem:[#allocation8 + $0x8] sm:$0xff] }
 0x25e   :  { %v520_v50 = vpop.f32.mrf.mxu0 }
 0x25f   :  { %v882_v52 = vadd.f32 1.0, %v526_v49  ;;  %v521_v53 = vadd.f32 %v2791_v47, %v520_v50  ;;  %v1322_v49 = vld [vmem:[#allocation10 + $0x8] sm:$0xff] }
 0x261   :  { %v881_v56 = vadd.f32 1.0, %v521_v53  ;;  %v884_v57 = vmul.f32 %v882_v52, %v3898_v51  ;;  %v1321_v52 = vld [vmem:[#allocation10] sm:$0xff] }
 0x263   :  { %v883_v59 = vmul.f32 %v881_v56, %v3903_v54  ;;  %v886_v62 = vadd.f32 %v884_v57, %v438_v60 }
 0x264   :  { %v3934_v5 = vpop.f32.mrf.mxu0 }
 0x265   :  { %v885_v61 = vadd.f32 %v883_v59, %v433_v58 }
 0x266   :  { %v3936_v6 = vpop.f32.mrf.mxu0 }
 0x267   :  { %3087 = vmatprep.mubr.msk.f32.mxu1 %vm359_vm2, %v885_v61  ;;  %3098 = vmatprep.mubr.msk.f32.mxu0 %vm359_vm2, %v885_v61 }
 0x268   :  { %3088 = vmatmul.mubr.msk.f32.vlgmr.msra.gmra.mxu1 %vm359_vm2, %v886_v62  ;;  %3099 = vmatmul.mubr.msk.f32.vlgmr.msra.gmra.mxu0 %vm359_vm2, %v886_v62 }
 0x269   :  { %3102 = vmatpush3.msra.mxu1 %v1054_v43  ;;  %3109 = vmatprep.mubr.msk.f32.mxu1 %vm359_vm2, %v885_v61 }
 0x26a   :  { %3103 = vmatprep.subr.mxu1 %v1053_v63  ;;  %3113 = vmatpush3.msra.mxu0 %v250_v44 }
 0x26b   :  { %3104 = vmatpush3.msra.mxu1 %v1053_v63  ;;  %3114 = vmatprep.subr.mxu0 %v249_v2 }
 0x26c   :  { %3105 = vmatprep.subr.mxu1 %v1052_v0  ;;  %3115 = vmatpush3.msra.mxu0 %v249_v2  ;;  %v3938_v7 = vpop.f32.mrf.mxu0 }
 0x26d   :  { %3106 = vmatpush3.msra.mxu1 %v1052_v0  ;;  %3116 = vmatprep.subr.mxu0 %v248_v3 }
 0x26e   :  { %3107 = vmatprep.subr.mxu1 %v1051_v1  ;;  %3117 = vmatpush3.msra.mxu0 %v248_v3  ;;  %v3940_v8 = vpop.f32.mrf.mxu0 }
 0x26f   :  { %3108 = vmatpush3.msra.mxu1 %v1051_v1  ;;  %3118 = vmatprep.subr.mxu0 %v247_v4 }
 0x270   :  { %3110 = vmatmul.mubr.msk.f32.vlgmr.msra.gmra.mxu1 %vm359_vm2, %v886_v62  ;;  %3123 = vmatprep.subr.mxu1 %v250_v44 }
 0x271   :  { %3124 = vmatpush3.msra.mxu1 %v250_v44  ;;  %3119 = vmatpush3.msra.mxu0 %v247_v4 }
 0x272   :  { %3125 = vmatprep.subr.mxu1 %v249_v2  ;;  %3134 = vmatprep.subr.mxu0 %v1326_v21 }
 0x273   :  { %3126 = vmatpush3.msra.mxu1 %v249_v2  ;;  %v3979_v2 = vld [vmem:[%s4245_s13] ss:$0 sm:$0xff] }
 0x274   :  { %3127 = vmatprep.subr.mxu1 %v248_v3  ;;  %v3944_v10 = vpop.f32.mrf.mxu0 }
 0x275   :  { %3128 = vmatpush3.msra.mxu1 %v248_v3  ;;  %v2831_v3 = vld [vmem:[%s4245_s13 + $0x1] ss:$0 sm:$0xff] }
 0x276   :  { %3129 = vmatprep.subr.mxu1 %v247_v4  ;;  %v3948_v12 = vpop.f32.mrf.mxu0 }
 0x277   :  { %3130 = vmatpush3.msra.mxu1 %v247_v4 }
 0x278   :  { %3145 = vmatprep.subr.mxu1 %v1326_v21 }
 0x328   :  { %v3089_v13 = vpop.f32.mrf.mxu1  ;;  %v3100_v14 = vpop.f32.mrf.mxu0 }
 0x329   :  { %v1132_v19 = vmul.f32 %v3089_v13, %v3089_v13  ;;  %v1229_v20 = vmul.f32 %v3100_v14, %v3100_v14 }
 0x32a   :  { %v963_v15 = vpop.f32.mrf.mxu1  ;;  %v1042_v16 = vpop.f32.mrf.mxu0 }
 0x32b   :  { %v1131_v17 = vmul.f32 %v963_v15, %v963_v15  ;;  %v1228_v18 = vmul.f32 %v1042_v16, %v1042_v16 }
 0x32d   :  { %3120 = vmatprep.mubr.msk.f32.mxu0 %vm359_vm2, %v1131_v17  ;;  %3131 = vmatprep.mubr.msk.f32.mxu1 %vm359_vm2, %v1228_v18 }
 0x32e   :  { %3121 = vmatmul.mubr.msk.f32.vlgmr.msra.gmra.mxu0 %vm359_vm2, %v1132_v19  ;;  %3132 = vmatmul.mubr.msk.f32.vlgmr.msra.gmra.mxu1 %vm359_vm2, %v1229_v20 }
 0x32f   :  { %3135 = vmatpush3.msra.mxu0 %v1326_v21  ;;  %3146 = vmatpush3.msra.mxu1 %v1326_v21 }
 0x330   :  { %3136 = vmatprep.subr.mxu0 %v1325_v22  ;;  %3147 = vmatprep.subr.mxu1 %v1325_v22  ;;  %v3966_v25 = vpop.f32.mrf.mxu1 }
 0x331   :  { %3137 = vmatpush3.msra.mxu0 %v1325_v22  ;;  %3148 = vmatpush3.msra.mxu1 %v1325_v22  ;;  %v4008_v22 = vld [vmem:[%s4245_s13 + $0x2] ss:$0 sm:$0xff] }
 0x332   :  { %3138 = vmatprep.subr.mxu0 %v1324_v23  ;;  %3149 = vmatprep.subr.mxu1 %v1324_v23  ;;  %v3968_v26 = vpop.f32.mrf.mxu1 }
 0x333   :  { %3139 = vmatpush3.msra.mxu0 %v1324_v23  ;;  %3150 = vmatpush3.msra.mxu1 %v1324_v23  ;;  %v1652_v23 = vmul.f32 %v3966_v25, %v2831_v3 }
 0x334   :  { %3140 = vmatprep.subr.mxu0 %v1323_v24  ;;  %3151 = vmatprep.subr.mxu1 %v1323_v24 }
 0x335   :  { %3141 = vmatpush3.msra.mxu0 %v1323_v24  ;;  %3152 = vmatpush3.msra.mxu1 %v1323_v24 }
 0x3ee   :  { %v3122_v27 = vpop.f32.mrf.mxu0  ;;  %v3133_v28 = vpop.f32.mrf.mxu1 }
 0x3ef   :  { %v1215_v29 = vmax.f32 %v3122_v27, 1e-24  ;;  %v1312_v30 = vmax.f32 %v3133_v28, 1e-24 }
 0x3f0   :  { %v1205_v31 = vpop.f32.mrf.mxu0  ;;  %v1302_v32 = vpop.f32.mrf.mxu1 }
 0x3f1   :  { %3289 = vrsqrt.f32 %v1215_v29  ;;  %v1214_v33 = vmax.f32 %v1205_v31, 1e-24  ;;  %v1311_v34 = vmax.f32 %v1302_v32, 1e-24  ;;  %v4029_v31 = vld [vmem:[%s4245_s13 + $0x3] ss:$0 sm:$0xff] }
 0x3f2   :  { %3291 = vrsqrt.f32 %v1312_v30  ;;  %v1651_v30 = vmul.f32 %v2831_v3, %v3968_v26 }
 0x3f3   :  { %3293 = vrsqrt.f32 %v1214_v33  ;;  %v4037_v33 = vmul.f32 %v3966_v25, %v3979_v2 }
 0x3f4   :  { %3295 = vrsqrt.f32 %v1311_v34  ;;  %v2173_v34 = vmul.f32 %v3966_v25, %v4029_v31 }
 0x3fe   :  { %v3290_v35 = vpop.eup %3289 }
 0x3ff   :  { %v3292_v36 = vpop.eup %3291  ;;  %v1219_v38 = vmul.f32 %v3290_v35, %v3089_v13 }
 0x400   :  { %v3294_v37 = vpop.eup %3293  ;;  %v1316_v42 = vmul.f32 %v3292_v36, %v3100_v14  ;;  %v2172_v36 = vmul.f32 %v4029_v31, %v3968_v26 }
 0x401   :  { %v3296_v39 = vpop.eup %3295  ;;  %v1218_v41 = vmul.f32 %v3294_v37, %v963_v15  ;;  %v1227_v46 = vmul.f32 %v2818_v40, %v1219_v38 }
 0x402   :  { %v1315_v43 = vmul.f32 %v3296_v39, %v1042_v16  ;;  %v1318_v47 = vmul.f32 %v2818_v40, %v1316_v42  ;;  %v4049_v39 = vld [vmem:[#allocation13 + $0x8] sm:$0xff] }
 0x403   :  { %v1226_v44 = vmul.f32 %v2818_v40, %v1218_v41  ;;  %v1328_v16 = vmul.f32 %v1320_v48, %v1227_v46 }
 0x404   :  { %v1317_v45 = vmul.f32 %v2818_v40, %v1315_v43  ;;  %v1415_v56 = vmul.f32 %v1320_v48, %v1318_v47  ;;  %v4051_v43 = vld [vmem:[#allocation13] sm:$0xff] }
 0x405   :  { %3142 = vmatprep.mubr.msk.f32.mxu0 %vm359_vm2, %v1226_v44  ;;  %v1327_v62 = vmul.f32 %v1319_v55, %v1226_v44 }
 0x406   :  { %3153 = vmatprep.mubr.msk.f32.mxu1 %vm359_vm2, %v1317_v45  ;;  %3143 = vmatmul.mubr.msk.f32.vlgmr.msra.gmra.mxu0 %vm359_vm2, %v1227_v46  ;;  %v1414_v63 = vmul.f32 %v1319_v55, %v1317_v45 }
 0x407   :  { %3154 = vmatmul.mubr.msk.f32.vlgmr.msra.gmra.mxu1 %vm359_vm2, %v1318_v47 }
 0x4c6   :  { %v3144_v50 = vpop.f32.mrf.mxu0 }
 0x4c7   :  { %v3155_v53 = vpop.f32.mrf.mxu1  ;;  %v1411_v1 = vmul.f32 %v3144_v50, %v1322_v49 }
 0x4c8   :  { %v1498_v57 = vmul.f32 %v3155_v53, %v1322_v49  ;;  %v1401_v58 = vpop.f32.mrf.mxu0 }
 0x4c9   :  { %v1410_v59 = vmul.f32 %v1401_v58, %v1321_v52  ;;  %v1488_v60 = vpop.f32.mrf.mxu1  ;;  %v4001_v21 = vadd.f32 %v1411_v1, %v1328_v16 }
 0x4ca   :  { %v3974_v61 = vadd.f32 %v1498_v57, %v1415_v56  ;;  %v1497_v0 = vmul.f32 %v1488_v60, %v1321_v52 }
 0x4cb   :  { %v3984_v4 = vadd.f32 %v1410_v59, %v1327_v62  ;;  %v1509_v27 = vmul.f32 %v3979_v2, %v4001_v21  ;;  %v1648_v28 = vmul.f32 %v2831_v3, %v4001_v21  ;;  %v1948_v35 = vmul.f32 %v4008_v22, %v4001_v21 }
 0x4cc   :  { %v3986_v13 = vadd.f32 %v1497_v0, %v1414_v63  ;;  %v1511_v14 = vmul.f32 %v3979_v2, %v3974_v61  ;;  %v1650_v15 = vmul.f32 %v2831_v3, %v3974_v61  ;;  %v1950_v24 = vmul.f32 %v4008_v22, %v3974_v61 }
 0x4cd   :  { %v1508_v18 = vmul.f32 %v3979_v2, %v3984_v4  ;;  %v1647_v20 = vmul.f32 %v2831_v3, %v3984_v4  ;;  %v1947_v29 = vmul.f32 %v4008_v22, %v3984_v4 }
 0x4ce   :  { %3156 = vmatprep.subr.msk.mxu0 %vm359_vm2, %v1511_v14  ;;  %3163 = vmatprep.subr.msk.mxu1 %vm359_vm2, %v1650_v15  ;;  %v1510_v17 = vmul.f32 %v3979_v2, %v3986_v13  ;;  %v1649_v19 = vmul.f32 %v2831_v3, %v3986_v13  ;;  %v1949_v32 = vmul.f32 %v4008_v22, %v3986_v13 }
 0x4cf   :  { %3157 = vmatpush3.xpose.msk.msra.mxu0 %vm359_vm2, %v1511_v14  ;;  %3164 = vmatpush3.xpose.msk.msra.mxu1 %vm359_vm2, %v1650_v15 }
 0x4d0   :  { %3158 = vmatprep.subr.msk.mxu0 %vm359_vm2, %v1510_v17  ;;  %3160 = vmatprep.mubr.msk.f32.mxu0 %vm359_vm2, %v1508_v18 }
 0x4d1   :  { %3165 = vmatprep.subr.msk.mxu1 %vm359_vm2, %v1649_v19  ;;  %3167 = vmatprep.mubr.msk.f32.mxu1 %vm359_vm2, %v1647_v20 }
 0x4d3   :  { %3159 = vmatpush3.xpose.msk.msra.mxu0 %vm359_vm2, %v1510_v17  ;;  %3166 = vmatpush3.xpose.msk.msra.mxu1 %vm359_vm2, %v1649_v19 }
 0x4d4   :  { %3170 = vmatprep.subr.mxu0 %v1652_v23  ;;  %3184 = vmatprep.subr.msk.mxu1 %vm359_vm2, %v1950_v24 }
 0x4d6   :  { %3161 = vmatmul.mubr.msk.f32.vlgmr.msra.gmra.mxu0 %vm359_vm2, %v1509_v27  ;;  %3168 = vmatmul.mubr.msk.f32.vlgmr.msra.gmra.mxu1 %vm359_vm2, %v1648_v28 }
 0x4d7   :  { %3171 = vmatpush3.msra.mxu0 %v1652_v23  ;;  %3185 = vmatpush3.xpose.msk.msra.mxu1 %vm359_vm2, %v1950_v24 }
 0x4d8   :  { %3188 = vmatprep.mubr.msk.f32.mxu1 %vm359_vm2, %v1947_v29  ;;  %3172 = vmatprep.subr.mxu0 %v1651_v30 }
 0x4d9   :  { %3186 = vmatprep.subr.msk.mxu1 %vm359_vm2, %v1949_v32  ;;  %3173 = vmatpush3.msra.mxu0 %v1651_v30 }
 0x4da   :  { %3177 = vmatprep.subr.mxu0 %v4037_v33 }
 0x4db   :  { %3187 = vmatpush3.xpose.msk.msra.mxu1 %vm359_vm2, %v1949_v32 }
 0x4dc   :  { %3205 = vmatprep.subr.mxu1 %v2173_v34 }
 0x4de   :  { %3189 = vmatmul.mubr.msk.f32.vlgmr.msra.gmra.mxu1 %vm359_vm2, %v1948_v35 }
 0x4df   :  { %3206 = vmatpush3.msra.mxu1 %v2173_v34 }
 0x4e0   :  { %3207 = vmatprep.subr.mxu1 %v2172_v36 }
 0x4e1   :  { %3208 = vmatpush3.msra.mxu1 %v2172_v36 }
 0x596   :  { %v3162_v37 = vpop.f32.mrf.mxu0  ;;  %v3169_v38 = vpop.f32.mrf.mxu1 }
 0x597   :  { %v1602_v40 = vmul.f32 2.828427, %v3162_v37  ;;  %v1741_v44 = vmul.f32 2.828427, %v3169_v38 }
 0x598   :  { %v1592_v41 = vpop.f32.mrf.mxu0  ;;  %v1731_v42 = vpop.f32.mrf.mxu1 }
 0x599   :  { %v1601_v45 = vmul.f32 2.828427, %v1592_v41  ;;  %v1740_v46 = vmul.f32 2.828427, %v1731_v42  ;;  %v1604_v47 = vadd.f32 %v1602_v40, %v4049_v39  ;;  %v1743_v53 = vadd.f32 %v1741_v44, %v4049_v39 }
 0x59b   :  { %v1609_v48 = vsel %vm1605_vm3, %v1604_v47, -inf  ;;  %v1742_v49 = vadd.f32 %v1740_v46, %v4051_v43  ;;  %v1603_v50 = vadd.f32 %v1601_v45, %v4051_v43  ;;  %v1747_v60 = vsel %vm1605_vm3, %v1743_v53, -inf }
 0x59c   :  { %1610 = vmax.xlane.f32.xlu1 %v1609_v48 }
 0x59d   :  { %v1744_v52 = vsel %vm1605_vm3, %v1742_v49, -inf  ;;  %v1606_v57 = vsel %vm1605_vm3, %v1603_v50, -inf }
 0x59e   :  { %v3190_v55 = vpop.f32.mrf.mxu1  ;;  %1745 = vmax.xlane.f32.xlu0 %v1744_v52 }
 0x59f   :  { %v2041_v56 = vmul.f32 2.828427, %v3190_v55 }
 0x5a0   :  { %v2031_v58 = vpop.f32.mrf.mxu1  ;;  %1607 = vmax.xlane.f32.xlu1 %v1606_v57 }
 0x5a1   :  { %v2040_v59 = vmul.f32 2.828427, %v2031_v58  ;;  %v2043_v62 = vadd.f32 %v2041_v56, %v4049_v39 }
 0x5a2   :  { %1748 = vmax.xlane.f32.xlu0 %v1747_v60 }
 0x5a3   :  { %v2047_v63 = vsel %vm1605_vm3, %v2043_v62, -inf  ;;  %v2042_v0 = vadd.f32 %v2040_v59, %v4051_v43 }
 0x5a4   :  { %2048 = vmax.xlane.f32.xlu1 %v2047_v63 }
 0x5a5   :  { %v2044_v1 = vsel %vm1605_vm3, %v2042_v0, -inf }
 0x5a6   :  { %2045 = vmax.xlane.f32.xlu0 %v2044_v1 }
 0x625   :  { %v1611_v3 = vpop.xlane.xlu1 %1610 }
 0x626   :  { %v1613_v17 = vsub.f32 %v1604_v47, %v1611_v3 }
 0x627   :  { %v1746_v14 = vpop.xlane.xlu0 %1745 }
 0x628   :  { %v1750_v15 = vsub.f32 %v1742_v49, %v1746_v14  ;;  %v1616_v28 = vmul.f32 1.442695, %v1613_v17 }
 0x629   :  { %v1608_v16 = vpop.xlane.xlu1 %1607 }
 0x62a   :  { %v1752_v18 = vmul.f32 1.442695, %v1750_v15  ;;  %v1612_v19 = vsub.f32 %v1603_v50, %v1608_v16 }
 0x62b   :  { %v1749_v20 = vpop.xlane.xlu0 %1748 }
 0x62c   :  { %3297 = vpow2.f32 %v1752_v18  ;;  %v1614_v23 = vmul.f32 1.442695, %v1612_v19  ;;  %v1751_v24 = vsub.f32 %v1743_v53, %v1749_v20 }
 0x62d   :  { %v2049_v27 = vpop.xlane.xlu1 %2048 }
 0x62e   :  { %3299 = vpow2.f32 %v1614_v23  ;;  %v1754_v29 = vmul.f32 1.442695, %v1751_v24  ;;  %v2051_v30 = vsub.f32 %v2043_v62, %v2049_v27 }
 0x62f   :  { %v2046_v32 = vpop.xlane.xlu0 %2045 }
 0x630   :  { %3301 = vpow2.f32 %v1754_v29  ;;  %v2050_v34 = vsub.f32 %v2042_v0, %v2046_v32  ;;  %v2054_v35 = vmul.f32 1.442695, %v2051_v30 }
 0x631   :  { %3303 = vpow2.f32 %v1616_v28 }
 0x632   :  { %v2052_v36 = vmul.f32 1.442695, %v2050_v34 }
 0x634   :  { %3305 = vpow2.f32 %v2052_v36 }
 0x635   :  { %3307 = vpow2.f32 %v2054_v35 }
 0x639   :  { %v3298_v37 = vpop.eup %3297 }
 0x63a   :  { %v1756_v38 = vsel %vm1605_vm3, %v3298_v37, 0.0 }
 0x63b   :  { %v3300_v40 = vpop.eup %3299  ;;  %1757 = vadd.xlane.f32.xlu0 %v1756_v38 }
 0x63c   :  { %v1618_v44 = vsel %vm1605_vm3, %v3300_v40, 0.0 }
 0x63d   :  { %v3302_v41 = vpop.eup %3301 }
 0x63e   :  { %v1759_v42 = vsel %vm1605_vm3, %v3302_v41, 0.0  ;;  %v3304_v45 = vpop.eup %3303 }
 0x63f   :  { %1760 = vadd.xlane.f32.xlu1 %v1759_v42  ;;  %1619 = vadd.xlane.f32.xlu0 %v1618_v44  ;;  %v1621_v47 = vsel %vm1605_vm3, %v3304_v45, 0.0 }
 0x641   :  { %v3306_v46 = vpop.eup %3305 }
 0x642   :  { %v2056_v48 = vsel %vm1605_vm3, %v3306_v46, 0.0  ;;  %v3308_v49 = vpop.eup %3307 }
 0x643   :  { %1622 = vadd.xlane.f32.xlu1 %v1621_v47  ;;  %2057 = vadd.xlane.f32.xlu0 %v2056_v48  ;;  %v2059_v50 = vsel %vm1605_vm3, %v3308_v49, 0.0 }
 0x647   :  { %2060 = vadd.xlane.f32.xlu1 %v2059_v50 }
 0x6c4   :  { %v1758_v52 = vpop.xlane.xlu0 %1757 }
 0x6c5   :  { %3309 = vrcp.f32 %v1758_v52 }
 0x6c8   :  { %v1620_v53 = vpop.xlane.xlu0 %1619  ;;  %v1761_v55 = vpop.xlane.xlu1 %1760 }
 0x6c9   :  { %3311 = vrcp.f32 %v1620_v53 }
 0x6ca   :  { %3313 = vrcp.f32 %v1761_v55 }
 0x6cc   :  { %v2058_v56 = vpop.xlane.xlu0 %2057  ;;  %v1623_v57 = vpop.xlane.xlu1 %1622 }
 0x6cd   :  { %3315 = vrcp.f32 %v2058_v56 }
 0x6ce   :  { %3317 = vrcp.f32 %v1623_v57 }
 0x6d0   :  { %v2061_v58 = vpop.xlane.xlu1 %2060 }
 0x6d1   :  { %3319 = vrcp.f32 %v2061_v58  ;;  %v1512_v58 = vmul.f32 %v3979_v2, %v3968_v26  ;;  %v1951_v2 = vmul.f32 %v4008_v22, %v3968_v26  ;;  %v2170_v26 = vmul.f32 %v4029_v31, %v3986_v13 }
 0x6d2   :  { %v3310_v59 = vpop.eup %3309 }
 0x6d3   :  { %v1764_v62 = vmul.f32 %v3310_v59, %v3298_v37 }
 0x6d5   :  { %v1766_v14 = vsel %vm1605_vm3, %v1764_v62, 0.0 }
 0x6d6   :  { %v3312_v60 = vpop.eup %3311 }
 0x6d7   :  { %v3314_v63 = vpop.eup %3313  ;;  %v1626_v3 = vmul.f32 %v3312_v60, %v3300_v40 }
 0x6d8   :  { %v1765_v0 = vmul.f32 %v3314_v63, %v3302_v41  ;;  %v1952_v63 = vmul.f32 %v3966_v25, %v4008_v22  ;;  %v2171_v25 = vmul.f32 %v4029_v31, %v3974_v61  ;;  %v2169_v61 = vmul.f32 %v4029_v31, %v4001_v21 }
 0x6d9   :  { %v1628_v24 = vsel %vm1605_vm3, %v1626_v3, 0.0  ;;  %v2168_v3 = vmul.f32 %v4029_v31, %v3984_v4 }
 0x6da   :  { %v3316_v1 = vpop.eup %3315  ;;  %v1767_v15 = vsel %vm1605_vm3, %v1765_v0, 0.0 }
 0x6db   :  { %v3318_v16 = vpop.eup %3317  ;;  %v1768_v17 = vadd.f32 %v1767_v15, %v1766_v14  ;;  %v2064_v19 = vmul.f32 %v3316_v1, %v3306_v46  ;;  %v4079_v46 = vld [vmem:[#allocation11 + $0x8] sm:$0xff] }
 0x6dc   :  { %v1627_v18 = vmul.f32 %v3318_v16, %v3304_v45  ;;  %v4077_v45 = vld [vmem:[#allocation11] sm:$0xff] }
 0x6dd   :  { %v1769_v20 = vrot.slane %v1768_v17, 4  ;;  %v2066_v35 = vsel %vm1605_vm3, %v2064_v19, 0.0 }
 0x6de   :  { %v3320_v23 = vpop.eup %3319  ;;  %v1629_v27 = vsel %vm1605_vm3, %v1627_v18, 0.0 }
 0x6df   :  { %v2065_v28 = vmul.f32 %v3320_v23, %v3308_v49  ;;  %v1770_v29 = vadd.f32 %v1769_v20, %v1768_v17  ;;  %v1630_v30 = vadd.f32 %v1629_v27, %v1628_v24 }
 0x6e1   :  { %v1771_v32 = vrot.slane %v1770_v29, 2  ;;  %v1631_v34 = vrot.slane %v1630_v30, 4  ;;  %v2067_v36 = vsel %vm1605_vm3, %v2065_v28, 0.0 }
 0x6e2   :  { %v2068_v37 = vadd.f32 %v2067_v36, %v2066_v35 }
 0x6e3   :  { %v1772_v38 = vadd.f32 %v1771_v32, %v1770_v29  ;;  %v1632_v40 = vadd.f32 %v1631_v34, %v1630_v30 }
 0x6e4   :  { %v2069_v41 = vrot.slane %v2068_v37, 4 }
 0x6e5   :  { %v1773_v42 = vrot.slane %v1772_v38, 1  ;;  %v1633_v44 = vrot.slane %v1632_v40, 2 }
 0x6e6   :  { %v2070_v47 = vadd.f32 %v2069_v41, %v2068_v37 }
 0x6e7   :  { %v1774_v48 = vadd.f32 %v1773_v42, %v1772_v38  ;;  %v1634_v49 = vadd.f32 %v1633_v44, %v1632_v40 }
 0x6e8   :  { %v2071_v50 = vrot.slane %v2070_v47, 2 }
 0x6e9   :  { %v1775_v52 = vmul.f32 %v1774_v48, %v4077_v45  ;;  %v1776_v53 = vmul.f32 %v1774_v48, %v4079_v46  ;;  %v1635_v55 = vrot.slane %v1634_v49, 1 }
 0x6ea   :  { %v2072_v56 = vadd.f32 %v2071_v50, %v2070_v47 }
 0x6eb   :  { %3174 = vmatprep.mubr.msk.f32.mxu0 %vm1605_vm3, %v1775_v52  ;;  %v1636_v57 = vadd.f32 %v1635_v55, %v1634_v49 }
 0x6ec   :  { %3175 = vmatmul.mubr.msk.f32.vlgmr.msra.gmra.mxu0 %vm1605_vm3, %v1776_v53  ;;  %v2073_v59 = vrot.slane %v2072_v56, 1 }
 0x6ed   :  { %3178 = vmatpush3.msra.mxu0 %v4037_v33  ;;  %v1637_v60 = vmul.f32 %v1636_v57, %v4077_v45  ;;  %v1638_v62 = vmul.f32 %v1636_v57, %v4079_v46 }
 0x6ee   :  { %3179 = vmatprep.subr.mxu0 %v1512_v58  ;;  %v2074_v0 = vadd.f32 %v2073_v59, %v2072_v56 }
 0x6ef   :  { %3180 = vmatpush3.msra.mxu0 %v1512_v58  ;;  %3181 = vmatprep.mubr.msk.f32.mxu0 %vm1605_vm3, %v1637_v60 }
 0x6f0   :  { %3191 = vmatprep.subr.mxu0 %v1952_v63  ;;  %3182 = vmatmul.mubr.msk.f32.vlgmr.msra.gmra.mxu0 %vm1605_vm3, %v1638_v62  ;;  %v2075_v33 = vmul.f32 %v2074_v0, %v4077_v45  ;;  %v2076_v1 = vmul.f32 %v2074_v0, %v4079_v46 }
 0x6f1   :  { %3192 = vmatpush3.msra.mxu0 %v1952_v63 }
 0x6f2   :  { %3193 = vmatprep.subr.mxu0 %v1951_v2  ;;  %3195 = vmatprep.mubr.msk.f32.mxu0 %vm1605_vm3, %v2075_v33  ;;  %v2383_v33 = vld [vmem:[#allocation14 + $0x10] sm:$0xff] }
 0x6f3   :  { %3194 = vmatpush3.msra.mxu0 %v1951_v2 }
 0x6f4   :  { %3198 = vmatprep.subr.msk.mxu0 %vm359_vm2, %v2171_v25  ;;  %3196 = vmatmul.mubr.msk.f32.vlgmr.msra.gmra.mxu0 %vm1605_vm3, %v2076_v1  ;;  %v2382_v1 = vld [vmem:[#allocation14 + $0x8] sm:$0xff] }
 0x6f5   :  { %3199 = vmatpush3.xpose.msk.msra.mxu0 %vm359_vm2, %v2171_v25  ;;  %3202 = vmatprep.mubr.msk.f32.mxu0 %vm359_vm2, %v2168_v3  ;;  %v2381_v25 = vld [vmem:[#allocation14] sm:$0xff] }
 0x6f6   :  { %3200 = vmatprep.subr.msk.mxu0 %vm359_vm2, %v2170_v26 }
 0x6f9   :  { %3201 = vmatpush3.xpose.msk.msra.mxu0 %vm359_vm2, %v2170_v26 }
 0x6fc   :  { %3203 = vmatmul.mubr.msk.f32.vlgmr.msra.gmra.mxu0 %vm359_vm2, %v2169_v61 }
 0x7ac   :  { %v3176_v4 = vpop.f32.mrf.mxu0 }
 0x7ae   :  { %v1849_v22 = vpop.f32.mrf.mxu0 }
 0x7b0   :  { %v3183_v14 = vpop.f32.mrf.mxu0 }
 0x7b1   :  { %v1936_v15 = vadd.f32 %v3183_v14, %v3176_v4 }
 0x7b2   :  { %v1930_v16 = vpop.f32.mrf.mxu0 }
 0x7b3   :  { %v1931_v17 = vadd.f32 %v1930_v16, %v1849_v22 }
 0x7b4   :  { %v3197_v13 = vpop.f32.mrf.mxu0 }
 0x7b5   :  { %v4114_v18 = vadd.f32 %v3197_v13, %v1936_v15 }
 0x7b6   :  { %v2149_v19 = vpop.f32.mrf.mxu0 }
 0x7b7   :  { %v2158_v20 = vadd.f32 %v2149_v19, %v1931_v17 }
 0x7bc   :  { %v3204_v23 = vpop.f32.mrf.mxu0 }
 0x7bd   :  { %v2262_v24 = vmul.f32 2.828427, %v3204_v23 }
 0x7be   :  { %v2252_v27 = vpop.f32.mrf.mxu0 }
 0x7bf   :  { %v2261_v28 = vmul.f32 2.828427, %v2252_v27  ;;  %v2264_v29 = vadd.f32 %v2262_v24, %v4049_v39  ;;  %v2795_v27 = vld [vmem:[%s4279_s3 + $0x2] ss:$0 sm:$0xff] }
 0x7c1   :  { %v2268_v21 = vsel %vm1605_vm3, %v2264_v29, -inf  ;;  %v2263_v31 = vadd.f32 %v2261_v28, %v4051_v43  ;;  %v2384_v43 = vld [vmem:[#allocation14 + $0x18] sm:$0xff] }
 0x7c2   :  { %2269 = vmax.xlane.f32.xlu1 %v2268_v21  ;;  %3212 = vmatprep.subr.mxu1 %v2384_v43 }
 0x7c3   :  { %v2265_v30 = vsel %vm1605_vm3, %v2263_v31, -inf }
 0x7c4   :  { %2266 = vmax.xlane.f32.xlu0 %v2265_v30  ;;  %v609_v30 = vadd.f32 %v2795_v27, %v3936_v6 }
 0x84b   :  { %v2270_v32 = vpop.xlane.xlu1 %2269 }
 0x84c   :  { %v2272_v34 = vsub.f32 %v2264_v29, %v2270_v32  ;;  %v614_v29 = vadd.f32 %v3934_v5, %v2795_v27 }
 0x84d   :  { %v2267_v35 = vpop.xlane.xlu0 %2266 }
 0x84e   :  { %v2275_v36 = vmul.f32 1.442695, %v2272_v34  ;;  %v2271_v37 = vsub.f32 %v2263_v31, %v2267_v35  ;;  %v2859_v35 = vld [vmem:[#allocation17] ss:$0 sm:$0xff] }
 0x850   :  { %3321 = vpow2.f32 %v2275_v36  ;;  %v2273_v38 = vmul.f32 1.442695, %v2271_v37 }
 0x852   :  { %3323 = vpow2.f32 %v2273_v38 }
 0x85d   :  { %v3322_v40 = vpop.eup %3321 }
 0x85e   :  { %v2280_v41 = vsel %vm1605_vm3, %v3322_v40, 0.0 }
 0x85f   :  { %v3324_v39 = vpop.eup %3323  ;;  %2281 = vadd.xlane.f32.xlu1 %v2280_v41 }
 0x860   :  { %v2277_v42 = vsel %vm1605_vm3, %v3324_v39, 0.0 }
 0x861   :  { %2278 = vadd.xlane.f32.xlu0 %v2277_v42 }
 0x8e8   :  { %v2282_v44 = vpop.xlane.xlu1 %2281 }
 0x8e9   :  { %3325 = vrcp.f32 %v2282_v44 }
 0x8ea   :  { %v2279_v47 = vpop.xlane.xlu0 %2278 }
 0x8eb   :  { %3327 = vrcp.f32 %v2279_v47  ;;  %v2525_v47 = vld [vmem:[#allocation19 + $0x18] sm:$0xff] }
 0x8ec   :  { %3223 = vmatprep.subr.mxu0 %v2525_v47 }
 0x8ed   :  { %3224 = vmatpush3.msra.mxu0 %v2525_v47 }
 0x8f6   :  { %v3326_v48 = vpop.eup %3325 }
 0x8f7   :  { %v2286_v49 = vmul.f32 %v3326_v48, %v3322_v40  ;;  %v2524_v48 = vld [vmem:[#allocation19 + $0x10] sm:$0xff] }
 0x8f8   :  { %v3328_v50 = vpop.eup %3327  ;;  %3225 = vmatprep.subr.mxu0 %v2524_v48 }
 0x8f9   :  { %v2285_v52 = vmul.f32 %v3328_v50, %v3324_v39  ;;  %v2288_v55 = vsel %vm1605_vm3, %v2286_v49, 0.0  ;;  %v2523_v49 = vld [vmem:[#allocation19 + $0x8] sm:$0xff]  ;;  %3226 = vmatpush3.msra.mxu0 %v2524_v48  ;;  %v2522_v50 = vld [vmem:[#allocation19] sm:$0xff]  ;;  %v2807_v48 = vld [vmem:[%s4279_s3 + $0x5] ss:$0 sm:$0xff] }
 0x8fa   :  { %3227 = vmatprep.subr.mxu0 %v2523_v49 }
 0x8fb   :  { %v2287_v53 = vsel %vm1605_vm3, %v2285_v52, 0.0  ;;  %3228 = vmatpush3.msra.mxu0 %v2523_v49  ;;  %v2863_v49 = vld [vmem:[#allocation22] ss:$0 sm:$0xff] }
 0x8fc   :  { %v2289_v56 = vadd.f32 %v2288_v55, %v2287_v53  ;;  %3229 = vmatprep.subr.mxu0 %v2522_v50  ;;  %v2803_v55 = vld [vmem:[%s4279_s3 + $0x4] ss:$0 sm:$0xff] }
 0x8fd   :  { %3230 = vmatpush3.msra.mxu0 %v2522_v50 }
 0x8fe   :  { %v2290_v57 = vrot.slane %v2289_v56, 4 }
 0x900   :  { %v2291_v58 = vadd.f32 %v2290_v57, %v2289_v56  ;;  %v790_v56 = vadd.f32 %v3942_v9, %v2803_v55  ;;  %v785_v57 = vadd.f32 %v2803_v55, %v3946_v11 }
 0x902   :  { %v2292_v59 = vrot.slane %v2291_v58, 2 }
 0x904   :  { %v2293_v60 = vadd.f32 %v2292_v59, %v2291_v58  ;;  %v2799_v59 = vld [vmem:[%s4279_s3 + $0x3] ss:$0 sm:$0xff] }
 0x905   :  { %v697_v9 = vadd.f32 %v2799_v59, %v3940_v8  ;;  %v2645_v8 = vld [vmem:[%s4253_s21 + $0x68] sm:$0xff] }
 0x906   :  { %v2294_v62 = vrot.slane %v2293_v60, 1 }
 0x908   :  { %v2295_v63 = vadd.f32 %v2294_v62, %v2293_v60  ;;  %v2517_v60 = vadd.f32 1.0, %v790_v56 }
 0x90a   :  { %v2296_v0 = vmul.f32 %v2295_v63, %v4077_v45  ;;  %v2297_v2 = vmul.f32 %v2295_v63, %v4079_v46  ;;  %v2856_v46 = vld [vmem:[#allocation16] ss:$0 sm:$0xff] }
 0x90c   :  { %3209 = vmatprep.mubr.msk.f32.mxu1 %vm1605_vm3, %v2296_v0  ;;  %v2516_v0 = vadd.f32 1.0, %v785_v57  ;;  %v2864_v57 = vld [vmem:[%s4255_s23] ss:$0 sm:$0xff]  ;;  %s3656_s23 = smov [#allocation23]  }
 0x90d   :  { %3210 = vmatmul.mubr.msk.f32.vlgmr.msra.gmra.mxu1 %vm1605_vm3, %v2297_v2  ;;  %v702_v2 = vadd.f32 %v3938_v7, %v2799_v59  ;;  %v2646_v7 = vld [vmem:[%s4253_s21 + $0x70] sm:$0xff]  ;;  %s2766_s3 = sshll.u32 %s3656_s23, 4  ;;  %s2767_s3 = int_to_ptr.vmem [resolvable:$true] %s2766_s3 }
 0x90e   :  { %3213 = vmatpush3.msra.mxu1 %v2384_v43  ;;  %s3605_s8 = scalar_lea.vmem %s2767_s3, 256  ;;  %p3610_p10 = scmp.lt.s32.totalorder %s2767_s3, %s2767_s3 }
 0x90f   :  { %3214 = vmatprep.subr.mxu1 %v2383_v33  ;;  %p3606_p9 = scmp.ne.s32.totalorder %s2767_s3, %s3605_s8  ;;  %p3611_p11 = scmp.lt.s32.totalorder %s3605_s8, %s3605_s8 }
 0x910   :  { %3215 = vmatpush3.msra.mxu1 %v2383_v33 }
 0x911   :  { %3216 = vmatprep.subr.mxu1 %v2382_v1  ;;  %p3612_p12 = por %p3611_p11, %p3610_p10 }
 0x912   :  { %3217 = vmatpush3.msra.mxu1 %v2382_v1 }
 0x913   :  { %3218 = vmatprep.subr.mxu1 %v2381_v25  ;;  %p3613_p13 = pnand %p3612_p12, %p3606_p9 }
 0x914   :  { %3219 = vmatpush3.msra.mxu1 %v2381_v25 }
 0x9cd   :  { %v3211_v3 = vpop.f32.mrf.mxu1 }
 0x9ce   :  { %v2380_v45 = vadd.f32 %v3211_v3, %v4114_v18 }
 0x9cf   :  { %v2370_v26 = vpop.f32.mrf.mxu1 }
 0x9d0   :  { %v2379_v61 = vadd.f32 %v2370_v26, %v2158_v20  ;;  %v2647_v26 = vld [vmem:[%s4253_s21 + $0x78] sm:$0xff] }
 0x9d1   :  { %3234 = vmatprep.subr.mxu1 %v2647_v26 }
 0x9d2   :  { %3220 = vmatprep.mubr.msk.f32.mxu1 %vm359_vm2, %v2379_v61  ;;  %v2644_v61 = vld [vmem:[%s4253_s21 + $0x60] sm:$0xff] }
 0x9d3   :  { %3221 = vmatmul.mubr.msk.f32.vlgmr.msra.gmra.mxu1 %vm359_vm2, %v2380_v45  ;;  %v2643_v45 = vld [vmem:[%s4253_s21 + $0x58] sm:$0xff] }
 0x9d4   :  { %3235 = vmatpush3.msra.mxu1 %v2647_v26 }
 0x9d5   :  { %3236 = vmatprep.subr.mxu1 %v2646_v7 }
 0x9d6   :  { %3237 = vmatpush3.msra.mxu1 %v2646_v7 }
 0x9d7   :  { %3238 = vmatprep.subr.mxu1 %v2645_v8 }
 0x9d8   :  { %3239 = vmatpush3.msra.mxu1 %v2645_v8 }
 0x9d9   :  { %3240 = vmatprep.subr.mxu1 %v2644_v61 }
 0x9da   :  { %3241 = vmatpush3.msra.mxu1 %v2644_v61 }
 0x9db   :  { %3242 = vmatprep.subr.mxu1 %v2643_v45 }
 0x9dc   :  { %3243 = vmatpush3.msra.mxu1 %v2643_v45 }
 0xa93   :  { %v3222_v4 = vpop.f32.mrf.mxu1 }
 0xa94   :  { %v2470_v22 = vadd.f32 %v3222_v4, %v2856_v46  ;;  %v2641_v4 = vld [vmem:[%s4253_s21 + $0x48] sm:$0xff] }
 0xa95   :  { %v2464_v14 = vpop.f32.mrf.mxu1 }
 0xa96   :  { %v2465_v15 = vadd.f32 %v2856_v46, %v2464_v14  ;;  %v2474_v16 = vmul.f32 %v2470_v22, %v2470_v22  ;;  %v2642_v46 = vld [vmem:[%s4253_s21 + $0x50] sm:$0xff]  ;;  %v2639_v14 = vld [vmem:[%s4253_s21 + $0x38] sm:$0xff] }
 0xa97   :  { %3244 = vmatprep.subr.mxu1 %v2642_v46 }
 0xa98   :  { %v2478_v17 = vsel %vm359_vm2, %v2474_v16, 0.0  ;;  %v2473_v13 = vmul.f32 %v2465_v15, %v2465_v15  ;;  %3245 = vmatpush3.msra.mxu1 %v2642_v46  ;;  %v2637_v16 = vld [vmem:[%s4253_s21 + $0x28] sm:$0xff] }
 0xa99   :  { %2479 = vadd.xlane.f32.xlu1 %v2478_v17  ;;  %3246 = vmatprep.subr.mxu1 %v2641_v4  ;;  %v2636_v17 = vld [vmem:[%s4253_s21 + $0x20] sm:$0xff] }
 0xa9a   :  { %v2475_v19 = vsel %vm359_vm2, %v2473_v13, 0.0  ;;  %3247 = vmatpush3.msra.mxu1 %v2641_v4  ;;  %v2635_v13 = vld [vmem:[%s4253_s21 + $0x18] sm:$0xff] }
 0xa9b   :  { %2476 = vadd.xlane.f32.xlu0 %v2475_v19  ;;  %v2634_v19 = vld [vmem:[%s4253_s21 + $0x10] sm:$0xff] }
 0xb22   :  { %v2480_v20 = vpop.xlane.xlu1 %2479 }
 0xb23   :  { %v2482_v23 = vmax.f32 %v2480_v20, 1e-24  ;;  %v2633_v20 = vld [vmem:[%s4253_s21 + $0x8] sm:$0xff] }
 0xb24   :  { %v2477_v18 = vpop.xlane.xlu0 %2476 }
 0xb25   :  { %3329 = vrsqrt.f32 %v2482_v23  ;;  %v2481_v24 = vmax.f32 %v2477_v18, 1e-24  ;;  %v2632_v23 = vld [vmem:[%s4253_s21] sm:$0xff]  ;;  %v2860_v18 = vld [vmem:[#allocation20] ss:$0 sm:$0xff] }
 0xb27   :  { %3331 = vrsqrt.f32 %v2481_v24 }
 0xb32   :  { %v3330_v28 = vpop.eup %3329 }
 0xb33   :  { %v2486_v21 = vmul.f32 %v3330_v28, %v2470_v22  ;;  %v2640_v22 = vld [vmem:[%s4253_s21 + $0x40] sm:$0xff] }
 0xb34   :  { %v3332_v31 = vpop.eup %3331  ;;  %3248 = vmatprep.subr.mxu1 %v2640_v22 }
 0xb35   :  { %v2488_v32 = vmul.f32 %v2486_v21, %v614_v29  ;;  %v2485_v34 = vmul.f32 %v3332_v31, %v2465_v15  ;;  %3249 = vmatpush3.msra.mxu1 %v2640_v22  ;;  %v2638_v15 = vld [vmem:[%s4253_s21 + $0x30] sm:$0xff] }
 0xb36   :  { %3250 = vmatprep.subr.mxu1 %v2639_v14 }
 0xb37   :  { %v2491_v36 = vsub.f32 %v2488_v32, %v3898_v51  ;;  %v2487_v37 = vmul.f32 %v2485_v34, %v609_v30  ;;  %3251 = vmatpush3.msra.mxu1 %v2639_v14 }
 0xb38   :  { %3252 = vmatprep.subr.mxu1 %v2638_v15 }
 0xb39   :  { %v2499_v38 = vmul.f32 %v2859_v35, %v2491_v36  ;;  %v2490_v40 = vsub.f32 %v2487_v37, %v3903_v54  ;;  %3253 = vmatpush3.msra.mxu1 %v2638_v15 }
 0xb3a   :  { %3254 = vmatprep.subr.mxu1 %v2637_v16 }
 0xb3b   :  { %v2501_v41 = vadd.f32 %v2499_v38, %v3898_v51  ;;  %v2498_v39 = vmul.f32 %v2859_v35, %v2490_v40  ;;  %3255 = vmatpush3.msra.mxu1 %v2637_v16 }
 0xb3c   :  { %3256 = vmatprep.subr.mxu1 %v2636_v17 }
 0xb3d   :  { %v2503_v42 = vmul.f32 %v2501_v41, %v2501_v41  ;;  %v2500_v43 = vadd.f32 %v2498_v39, %v3903_v54  ;;  %3257 = vmatpush3.msra.mxu1 %v2636_v17 }
 0xb3e   :  { %3258 = vmatprep.subr.mxu1 %v2635_v13 }
 0xb3f   :  { %v2507_v5 = vsel %vm359_vm2, %v2503_v42, 0.0  ;;  %v2502_v44 = vmul.f32 %v2500_v43, %v2500_v43  ;;  %3259 = vmatpush3.msra.mxu1 %v2635_v13 }
 0xb40   :  { %2508 = vadd.xlane.f32.xlu1 %v2507_v5  ;;  %3260 = vmatprep.subr.mxu1 %v2634_v19 }
 0xb41   :  { %v2504_v6 = vsel %vm359_vm2, %v2502_v44, 0.0  ;;  %3261 = vmatpush3.msra.mxu1 %v2634_v19 }
 0xb42   :  { %2505 = vadd.xlane.f32.xlu0 %v2504_v6  ;;  %3262 = vmatprep.subr.mxu1 %v2633_v20 }
 0xb43   :  { %3263 = vmatpush3.msra.mxu1 %v2633_v20 }
 0xb44   :  { %3264 = vmatprep.subr.mxu1 %v2632_v23 }
 0xb45   :  { %3265 = vmatpush3.msra.mxu1 %v2632_v23 }
 0xbc9   :  { %v2509_v51 = vpop.xlane.xlu1 %2508 }
 0xbca   :  { %v2511_v54 = vmax.f32 %v2509_v51, 1e-24  ;;  %v878_v51 = vadd.f32 %v3944_v10, %v2807_v48 }
 0xbcb   :  { %v2506_v52 = vpop.xlane.xlu0 %2505 }
 0xbcc   :  { %3333 = vrsqrt.f32 %v2511_v54  ;;  %v2510_v53 = vmax.f32 %v2506_v52, 1e-24 }
 0xbce   :  { %3335 = vrsqrt.f32 %v2510_v53  ;;  %v873_v53 = vadd.f32 %v2807_v48, %v3948_v12 }
 0xbd9   :  { %v3334_v58 = vpop.eup %3333 }
 0xbda   :  { %v4152_v62 = vmul.f32 %v3334_v58, %v2501_v41 }
 0xbdb   :  { %v3336_v63 = vpop.eup %3335 }
 0xbdc   :  { %v4155_v33 = vmul.f32 %v3336_v63, %v2500_v43  ;;  %v2519_v1 = vmul.f32 %v2517_v60, %v4152_v62 }
 0xbde   :  { %v2518_v11 = vmul.f32 %v2516_v0, %v4155_v33  ;;  %v2521_v25 = vadd.f32 %v2519_v1, %v702_v2 }
 0xbe0   :  { %v2520_v3 = vadd.f32 %v2518_v11, %v697_v9 }
 0xbe2   :  { %3231 = vmatprep.mubr.msk.f32.mxu0 %vm359_vm2, %v2520_v3 }
 0xbe3   :  { %3232 = vmatmul.mubr.msk.f32.vlgmr.msra.gmra.mxu0 %vm359_vm2, %v2521_v25 }
 0xca3   :  { %v3233_v24 = vpop.f32.mrf.mxu0 }
 0xca4   :  { %v2611_v27 = vadd.f32 %v3233_v24, %v2860_v18 }
 0xca5   :  { %v2605_v28 = vpop.f32.mrf.mxu0 }
 0xca6   :  { %v2615_v29 = vmul.f32 %v2611_v27, %v2611_v27  ;;  %v2606_v21 = vadd.f32 %v2860_v18, %v2605_v28 }
 0xca8   :  { %v2617_v31 = vmul.f32 %v2615_v29, %v2611_v27  ;;  %v2614_v30 = vmul.f32 %v2606_v21, %v2606_v21 }
 0xcaa   :  { %v2619_v32 = vmul.f32 0.044715, %v2617_v31  ;;  %v2616_v34 = vmul.f32 %v2614_v30, %v2606_v21 }
 0xcac   :  { %v2621_v35 = vadd.f32 %v2619_v32, %v2611_v27  ;;  %v2618_v36 = vmul.f32 0.044715, %v2616_v34 }
 0xcae   :  { %v2623_v37 = vmul.f32 0.7978846, %v2621_v35  ;;  %v2620_v38 = vadd.f32 %v2618_v36, %v2606_v21 }
 0xcb0   :  { %3337 = vtanh.f32 %v2623_v37  ;;  %v2622_v40 = vmul.f32 0.7978846, %v2620_v38 }
 0xcb2   :  { %3339 = vtanh.f32 %v2622_v40 }
 0xcbd   :  { %v3338_v41 = vpop.eup %3337 }
 0xcbe   :  { %v2627_v39 = vadd.f32 1.0, %v3338_v41 }
 0xcbf   :  { %v3340_v42 = vpop.eup %3339 }
 0xcc0   :  { %v2626_v43 = vadd.f32 1.0, %v3340_v42  ;;  %v2629_v5 = vmul.f32 0.5, %v2627_v39 }
 0xcc2   :  { %v2628_v44 = vmul.f32 0.5, %v2626_v43  ;;  %v2631_v47 = vmul.f32 %v2629_v5, %v2611_v27 }
 0xcc4   :  { %v2630_v6 = vmul.f32 %v2628_v44, %v2606_v21 }
 0xcc6   :  { %3266 = vmatprep.mubr.f32.mxu1 %v2630_v6 }
 0xcc7   :  { %3267 = vmatmul.mubr.f32.vlgmr.msra.gmra.mxu1 %v2631_v47 }
 0xd87   :  { %v3268_v50 = vpop.f32.mrf.mxu1 }
 0xd88   :  { %v2727_v54 = vadd.f32 %v3268_v50, %v2863_v49 }
 0xd89   :  { %v2721_v52 = vpop.f32.mrf.mxu1 }
 0xd8a   :  { %v2731_v55 = vmul.f32 %v2727_v54, %v878_v51  ;;  %v2722_v56 = vadd.f32 %v2863_v49, %v2721_v52 }
 0xd8c   :  { %v2734_v58 = vsub.f32 %v2731_v55, %v4152_v62  ;;  %v2730_v59 = vmul.f32 %v2722_v56, %v873_v53 }
 0xd8e   :  { %v2733_v60 = vsub.f32 %v2730_v59, %v4155_v33  ;;  %v2742_v63 = vmul.f32 %v2864_v57, %v2734_v58 }
 0xd90   :  { %v2744_v0 = vadd.f32 %v2742_v63, %v4152_v62  ;;  %v2741_v2 = vmul.f32 %v2864_v57, %v2733_v60 }
 0xd92   :  { %v2746_v10 = vmul.f32 %v2744_v0, %v2744_v0  ;;  %v2743_v1 = vadd.f32 %v2741_v2, %v4155_v33 }
 0xd94   :  { %v2750_v12 = vsel %vm359_vm2, %v2746_v10, 0.0  ;;  %v2745_v9 = vmul.f32 %v2743_v1, %v2743_v1 }
 0xd95   :  { %2751 = vadd.xlane.f32.xlu1 %v2750_v12 }
 0xd96   :  { %v2747_v11 = vsel %vm359_vm2, %v2745_v9, 0.0 }
 0xd97   :  { %2748 = vadd.xlane.f32.xlu0 %v2747_v11 }
 0xe1e   :  { %v2752_v25 = vpop.xlane.xlu1 %2751 }
 0xe1f   :  { %v2754_v3 = vmax.f32 %v2752_v25, 1e-24 }
 0xe20   :  { %v2749_v26 = vpop.xlane.xlu0 %2748 }
 0xe21   :  { %3341 = vrsqrt.f32 %v2754_v3  ;;  %v2753_v7 = vmax.f32 %v2749_v26, 1e-24 }
 0xe23   :  { %3343 = vrsqrt.f32 %v2753_v7 }
 0xe2e   :  { %v3342_v8 = vpop.eup %3341 }
 0xe2f   :  { %v2758_v62 = vmul.f32 %v3342_v8, %v2744_v0 }
 0xe30   :  { %v3344_v61 = vpop.eup %3343 }
 0xe31   :  { %v2757_v45 = vmul.f32 %v3344_v61, %v2743_v1  ;;  %2760 = vst.msk [vmem:[#allocation23 + $0x8] sm:$0xff] %vm359_vm2, %v2758_v62 }
 0xe33   :  { %2759 = vst.msk [vmem:[#allocation23] sm:$0xff] %vm359_vm2, %v2757_v45 }
 0xe34   :  { %3616 = shalt.err (!%p3613_p13)
}
 0xe35   :  { %2772 = dma.vmem_to_hbm [thread:$0]  %s2767_s3, 256, %s4256_s24, [#allocation4], %s3642_s28, %s3642_s28, %s3643_s6  }
 0xe36   :  { %3639 = dma.done.wait [#allocation4], 256  }
 0xe37   :  { %3640 = vsyncadd [#allocation4], 4294967040 }
 0xe38   :  { %2776 = vsyncpa [#allocation3], 1 }
 0xe39   :  { %2777 = vsyncpa [#allocation6], 1 }
 0xe3a   :  { %2778 = vsyncpa [#allocation9], 1 }
 0xe3b   :  { %2779 = vsyncpa [#allocation12], 1 }
 0xe3c   :  { %2780 = vsyncpa [#allocation15], 1 }
 0xe3d   :  { %2781 = vsyncpa [#allocation18], 1 }
 0xe3e   :  { %2782 = vsyncpa [#allocation21], 1 }
 0xe3f   :  { %2783 = vsyncpa [#allocation4], 1 }

</bundles_post_ra>
